<compile_context>
chip_gen: v6e
topology: v6e:2x2x1
jax: 0.10.0
libtpu: 0.0.40
codegen_flags: <defaults>
</compile_context>

<pallas_src>
import numpy as np
import jax
import jax.numpy as jnp
from jax.experimental import pallas as pl
from jax.experimental.pallas import tpu as pltpu

NETWORK_CHANNELS = 64          # network_channels in the module
N_BANDS = 8                    # feature.n_bands (synthetic, deterministic choice)
SEQ_LEN = 32                   # "32-step time sequence"
IN_FEATURES = N_BANDS * NETWORK_CHANNELS   # 512
NEG_SLOPE = 0.2
# Review: sweep 128-256.  128 is the universal default (bf16 x tile = 4 MiB,
# ~8 MiB double-buffered); vmem_limit_bytes below covers it on every generation.
DEFAULT_B_TILE = 128


def _leaky_relu(x):
    return jnp.where(x >= 0, x, NEG_SLOPE * x)


def summarizer_kernel(x_ref, wr_ref, br_ref, wcat_ref, b14_ref,
                      w5_ref, b5_ref, w6_ref, b6_ref,
                      out_ref, buf_ref):
    bt, T, F_ = x_ref.shape            # (B_TILE, 32, 512)
    C = br_ref.shape[-1]               # 64

    # ---- reducer: Linear(F -> C), batch folded into the matmul M dimension.
    # (bt, 32, F) -> (bt*32, F) is tile-aligned: free.  Result goes straight
    # into the aligned scratch (no separate h temp / copy).
    x = x_ref[...].reshape(bt * T, F_)                       # bf16
    buf_ref[...] = (jnp.dot(x, wr_ref[...], preferred_element_type=jnp.float32)
                    + br_ref[...])
    # buf rows: h flattened batch-major / time-minor, stored at offset 0.

    # ---- 4 x Conv1d(C, C, k=3, stride=2, pad=1) + LeakyReLU(0.2).
    # Output row j = (b, t):  y = w0*h[b,2t-1] + w1*h[b,2t] + w2*h[b,2t+1] + b
    L = T                      # per-element time length
    M = bt * T                 # flattened row count
    for layer in range(4):
        t_out = L // 2
        m_out = M // 2
        # Stride-2 taps: only kept output rows are computed (two strided vld
        # streams; the left tap is derived from the right tap, not re-loaded).
        c_tap = buf_ref[pl.ds(0, m_out, stride=2), :]        # h[b, 2t]
        r_tap = buf_ref[pl.ds(1, m_out, stride=2), :]        # h[b, 2t+1]
        # Left tap = right tap shifted down one output row; rows with t == 0
        # would cross a batch boundary -> masked to zero (conv zero padding).
        l_tap = jnp.concatenate(
            [jnp.zeros((1, C), jnp.float32), r_tap[:m_out - 1, :]], axis=0)
        t_idx = jax.lax.broadcasted_iota(jnp.int32, (m_out, 1), 0) & (t_out - 1)
        l_tap = jnp.where(t_idx != 0, l_tap, 0.0)
        # One K-fused (m_out, 3C) @ (3C, C) bf16 matmul instead of 3 thin dots.
        taps = jnp.concatenate([l_tap, c_tap, r_tap], axis=1).astype(jnp.bfloat16)
        y = (jnp.dot(taps, wcat_ref[layer], preferred_element_type=jnp.float32)
             + b14_ref[layer])
        # In-place, aligned store of the activation (ordered after the tap
        # reads through the data dependence on y).
        buf_ref[0:m_out, :] = _leaky_relu(y)
        L, M = t_out, m_out

    # ---- Conv1d(C, C, k=2, stride=2, pad=0): 2 steps -> 1 step, + LeakyReLU.
    e_tap = buf_ref[pl.ds(0, bt, stride=2), :]               # h[b, 0]
    o_tap = buf_ref[pl.ds(1, bt, stride=2), :]               # h[b, 1]
    taps5 = jnp.concatenate([e_tap, o_tap], axis=1).astype(jnp.bfloat16)
    h = _leaky_relu(jnp.dot(taps5, w5_ref[...],
                            preferred_element_type=jnp.float32) + b5_ref[...])

    # ---- Conv1d(C, C, k=1): pointwise, no activation after it.
    out_ref[...] = (jnp.dot(h.astype(jnp.bfloat16), w6_ref[...],
                            preferred_element_type=jnp.float32) + b6_ref[...])


def summarizer_forward(x, packed, b_tile=DEFAULT_B_TILE):
    B = x.shape[0]
    C = NETWORK_CHANNELS
    F_ = IN_FEATURES
    T = SEQ_LEN

    bt = max(1, min(b_tile, B))
    # v7x megacore: the batch axis is "parallel"; make sure there are >= 2 grid
    # blocks to shard across the 2 TensorCores whenever the batch can be split
    # into 8-row-aligned tiles (never let the tile swallow the whole batch).
    if bt >= B and B >= 16:
        bt = max(8, (B // 2) // 8 * 8)
    n_blocks = pl.cdiv(B, bt)
    Bp = n_blocks * bt

    # HBM-bound on x: feed it as bf16 (half the bytes); f32 accumulation inside.
    # TODO(synk): fp8(e4m3)+scale for x is a further v7x-only option.
    xb = x.astype(jnp.bfloat16)
    if Bp != B:
        xb = jnp.pad(xb, ((0, Bp - B), (0, 0), (0, 0)))

    # Raise the scoped-VMEM cap explicitly (v5e default is ~16 MiB):
    # double-buffered bf16 x tile + f32 scratch + headroom for compiler temps.
    vmem_limit = int(min(48 * 1024 * 1024,
                         2 * (bt * T * F_ * 2) + bt * T * C * 4 + (24 << 20)))

    out = pl.pallas_call(
        summarizer_kernel,
        out_shape=jax.ShapeDtypeStruct((Bp, C), jnp.float32),
        grid_spec=pltpu.PrefetchScalarGridSpec(
            num_scalar_prefetch=0,
            grid=(n_blocks,),
            in_specs=[
                pl.BlockSpec((bt, T, F_), lambda i: (i, 0, 0)),       # x (bf16)
                pl.BlockSpec((F_, C), lambda i: (0, 0)),              # reducer W (bf16)
                pl.BlockSpec((1, C), lambda i: (0, 0)),               # reducer b
                pl.BlockSpec((4, 3 * C, C), lambda i: (0, 0, 0)),     # conv1-4 fused taps (bf16)
                pl.BlockSpec((4, 1, C), lambda i: (0, 0, 0)),         # conv1-4 bias
                pl.BlockSpec((2 * C, C), lambda i: (0, 0)),           # conv5 fused taps (bf16)
                pl.BlockSpec((1, C), lambda i: (0, 0)),               # conv5 bias
                pl.BlockSpec((C, C), lambda i: (0, 0)),               # conv6 tap (bf16)
                pl.BlockSpec((1, C), lambda i: (0, 0)),               # conv6 bias
            ],
            out_specs=pl.BlockSpec((bt, C), lambda i: (i, 0)),
            scratch_shapes=[pltpu.VMEM((bt * T, C), jnp.float32)],
        ),
        compiler_params=pltpu.CompilerParams(
            dimension_semantics=("parallel",),
            vmem_limit_bytes=vmem_limit),
    )(xb, packed["wr_bf16"], packed["br"], packed["wcat"], packed["b14"],
      packed["w5"], packed["b5"], packed["w6"], packed["b6"])

    # back to PyTorch NCL layout: (B, C, 1)
    return out[:B, :, None]


def make_params(key):
    """Deterministic synthetic parameters in PyTorch layouts."""
    C = NETWORK_CHANNELS
    ks = [3, 3, 3, 3, 2, 1]
    keys = jax.random.split(key, 2 + 2 * len(ks))
    raw = {
        "wr": jax.random.normal(keys[0], (IN_FEATURES, C), jnp.float32)
              / np.sqrt(IN_FEATURES),
        "br": jax.random.normal(keys[1], (C,), jnp.float32) * 0.01,
        "conv_w": [],
        "conv_b": [],
    }
    for i, k in enumerate(ks):
        w = jax.random.normal(keys[2 + 2 * i], (C, C, k), jnp.float32) / np.sqrt(C * k)
        b = jax.random.normal(keys[3 + 2 * i], (C,), jnp.float32) * 0.01
        raw["conv_w"].append(w)
        raw["conv_b"].append(b)

    # Kernel packing: per-layer taps stacked along K as (3C, C) = [W.T[k=0];
    # W.T[k=1]; W.T[k=2]]; conv weights in bf16 for single-pass MXU.
    packed = {
        "wr_bf16": raw["wr"].astype(jnp.bfloat16),
        "br": raw["br"].reshape(1, C),
        "wcat": jnp.stack([jnp.transpose(w, (2, 1, 0)).reshape(3 * C, C)
                           for w in raw["conv_w"][:4]]).astype(jnp.bfloat16),
        "b14": jnp.stack([b.reshape(1, C) for b in raw["conv_b"][:4]]),
        "w5": jnp.transpose(raw["conv_w"][4], (2, 1, 0)).reshape(2 * C, C)
              .astype(jnp.bfloat16),
        "b5": raw["conv_b"][4].reshape(1, C),
        "w6": jnp.transpose(raw["conv_w"][5], (2, 1, 0))[0].astype(jnp.bfloat16),
        "b6": raw["conv_b"][5].reshape(1, C),
    }
    return raw, packed


def reference_forward(x, raw):
    """Pure-JAX (f32) reference mirroring the PyTorch module."""
    h = jnp.einsum("btf,fc->btc", x, raw["wr"],
                   precision=jax.lax.Precision.HIGHEST) + raw["br"]
    h = jnp.transpose(h, (0, 2, 1))                                  # (B, C, T)
    specs = [(3, 2, 1), (3, 2, 1), (3, 2, 1), (3, 2, 1), (2, 2, 0), (1, 1, 0)]
    for i, (_, s, p) in enumerate(specs):
        w = raw["conv_w"][i]
        b = raw["conv_b"][i]
        h = jax.lax.conv_general_dilated(
            h, w, window_strides=(s,), padding=[(p, p)],
            dimension_numbers=("NCH", "OIH", "NCH"),
            precision=jax.lax.Precision.HIGHEST)
        h = h + b[None, :, None]
        if i < 5:
            h = jnp.where(h >= 0, h, NEG_SLOPE * h)
    return h                                                         # (B, C, 1)


if __name__ == "__main__":
    key = jax.random.PRNGKey(0)
    pkey, xkey = jax.random.split(key)
    raw, packed = make_params(pkey)

    B = 12
    x = jax.random.normal(xkey, (B, SEQ_LEN, IN_FEATURES), jnp.float32)
    ref = reference_forward(x, raw)

    # multi-block + batch-padding path (B=12, tile=8 -> padded to 16, 2 blocks)
    out = jax.block_until_ready(summarizer_forward(x, packed, b_tile=8))
    assert out.shape == (B, NETWORK_CHANNELS, 1), out.shape
    np.testing.assert_allclose(np.asarray(out), np.asarray(ref),
                               rtol=3e-2, atol=3e-2)

    # single-block default-tile path
    out2 = jax.block_until_ready(summarizer_forward(x, packed))
    np.testing.assert_allclose(np.asarray(out2), np.asarray(ref),
                               rtol=3e-2, atol=3e-2)

    print("KERNEL_OK")
</pallas_src>

<mosaic_0001>
module attributes {stable_mosaic.version = 11 : i64} {
  func.func @summarizer_kernel(%arg0: i32, %arg1: memref<8x32x512xbf16, #tpu.memory_space<vmem>>, %arg2: memref<512x64xbf16, #tpu.memory_space<vmem>>, %arg3: memref<1x64xf32, #tpu.memory_space<vmem>>, %arg4: memref<4x192x64xbf16, #tpu.memory_space<vmem>>, %arg5: memref<4x1x64xf32, #tpu.memory_space<vmem>>, %arg6: memref<128x64xbf16, #tpu.memory_space<vmem>>, %arg7: memref<1x64xf32, #tpu.memory_space<vmem>>, %arg8: memref<64x64xbf16, #tpu.memory_space<vmem>>, %arg9: memref<1x64xf32, #tpu.memory_space<vmem>>, %arg10: memref<8x64xf32, #tpu.memory_space<vmem>>, %arg11: memref<256x64xf32, #tpu.memory_space<vmem>>) attributes {dimension_semantics = [#tpu.dimension_semantics<parallel>], iteration_bounds = array<i64: 2>, scalar_prefetch = 0 : i64, scratch_operands = 1 : i64, tpu.core_type = #tpu.core_type<tc>, window_params = [{transform_indices = @transform_0, window_bounds = array<i64: 8, 32, 512>}, {pipeline_mode = #tpu.pipeline_mode<synchronous>, transform_indices = @transform_1, window_bounds = array<i64: 512, 64>}, {pipeline_mode = #tpu.pipeline_mode<synchronous>, transform_indices = @transform_2, window_bounds = array<i64: 1, 64>}, {pipeline_mode = #tpu.pipeline_mode<synchronous>, transform_indices = @transform_3, window_bounds = array<i64: 4, 192, 64>}, {pipeline_mode = #tpu.pipeline_mode<synchronous>, transform_indices = @transform_4, window_bounds = array<i64: 4, 1, 64>}, {pipeline_mode = #tpu.pipeline_mode<synchronous>, transform_indices = @transform_5, window_bounds = array<i64: 128, 64>}, {pipeline_mode = #tpu.pipeline_mode<synchronous>, transform_indices = @transform_6, window_bounds = array<i64: 1, 64>}, {pipeline_mode = #tpu.pipeline_mode<synchronous>, transform_indices = @transform_7, window_bounds = array<i64: 64, 64>}, {pipeline_mode = #tpu.pipeline_mode<synchronous>, transform_indices = @transform_8, window_bounds = array<i64: 1, 64>}, {transform_indices = @transform_9, window_bounds = array<i64: 8, 64>}]} {
    %c0 = arith.constant 0 : index
    %c0_0 = arith.constant 0 : index
    %c0_1 = arith.constant 0 : index
    %0 = vector.load %arg1[%c0, %c0_0, %c0_1] : memref<8x32x512xbf16, #tpu.memory_space<vmem>>, vector<8x32x512xbf16>
    %1 = vector.shape_cast %0 : vector<8x32x512xbf16> to vector<256x512xbf16>
    %c0_2 = arith.constant 0 : index
    %c0_3 = arith.constant 0 : index
    %2 = vector.load %arg2[%c0_2, %c0_3] : memref<512x64xbf16, #tpu.memory_space<vmem>>, vector<512x64xbf16>
    %cst = arith.constant dense<0.000000e+00> : vector<256x64xf32>
    %3 = tpu.matmul %1, %2, %cst {dimension_numbers = #tpu.dot_dimension_numbers<[1], [0], [0], [1], [0, 0, 1, 1], [], []>} : vector<256x512xbf16>, vector<512x64xbf16>, vector<256x64xf32> -> vector<256x64xf32>
    %c0_4 = arith.constant 0 : index
    %c0_5 = arith.constant 0 : index
    %4 = vector.load %arg3[%c0_4, %c0_5] : memref<1x64xf32, #tpu.memory_space<vmem>>, vector<1x64xf32>
    %5 = vector.broadcast %4 : vector<1x64xf32> to vector<256x64xf32>
    %6 = arith.addf %3, %5 : vector<256x64xf32>
    %c0_6 = arith.constant 0 : index
    %c0_7 = arith.constant 0 : index
    %7 = vector.load %arg11[%c0_6, %c0_7] : memref<256x64xf32, #tpu.memory_space<vmem>>, vector<256x64xf32>
    tpu.vector_store %arg11[%c0_6, %c0_7], %6 {strides = array<i32>} : memref<256x64xf32, #tpu.memory_space<vmem>>, vector<256x64xf32>,
    %c0_8 = arith.constant 0 : index
    %c0_9 = arith.constant 0 : index
    %8 = tpu.strided_load %arg11[%c0_8, %c0_9] {strides = array<i32: 2, 1>} : memref<256x64xf32, #tpu.memory_space<vmem>>, vector<128x64xf32>
    %c1 = arith.constant 1 : index
    %c0_10 = arith.constant 0 : index
    %9 = tpu.strided_load %arg11[%c1, %c0_10] {strides = array<i32: 2, 1>} : memref<256x64xf32, #tpu.memory_space<vmem>>, vector<128x64xf32>
    %cst_11 = arith.constant 0.000000e+00 : f32
    %10 = vector.broadcast %cst_11 : f32 to vector<1x64xf32>
    %11 = vector.extract_strided_slice %9 {offsets = [0, 0], sizes = [127, 64], strides = [1, 1]} : vector<128x64xf32> to vector<127x64xf32>
    %12 = tpu.concatenate %10, %11 in 0 : vector<1x64xf32>, vector<127x64xf32> -> vector<128x64xf32>
    %13 = tpu.iota {dimensions = array<i32: 0>} : vector<128x1xi32>
    %c15_i32 = arith.constant 15 : i32
    %14 = vector.broadcast %c15_i32 : i32 to vector<128x1xi32>
    %15 = arith.andi %13, %14 : vector<128x1xi32>
    %c0_i32 = arith.constant 0 : i32
    %16 = vector.broadcast %c0_i32 : i32 to vector<128x1xi32>
    %17 = arith.cmpi ne, %15, %16 : vector<128x1xi32>
    %cst_12 = arith.constant 0.000000e+00 : f32
    %18 = vector.shape_cast %17 : vector<128x1xi1> to vector<128x1xi1>
    %19 = vector.broadcast %18 : vector<128x1xi1> to vector<128x64xi1>
    %20 = vector.broadcast %cst_12 : f32 to vector<128x64xf32>
    %21 = arith.select %19, %12, %20 : vector<128x64xi1>, vector<128x64xf32>
    %22 = tpu.concatenate %21, %8, %9 in 1 : vector<128x64xf32>, vector<128x64xf32>, vector<128x64xf32> -> vector<128x192xf32>
    %23 = arith.truncf %22 : vector<128x192xf32> to vector<128x192xbf16>
    %c0_13 = arith.constant 0 : index
    %c0_14 = arith.constant 0 : index
    %c0_15 = arith.constant 0 : index
    %24 = vector.load %arg4[%c0_13, %c0_14, %c0_15] : memref<4x192x64xbf16, #tpu.memory_space<vmem>>, vector<1x192x64xbf16>
    %25 = vector.shape_cast %24 : vector<1x192x64xbf16> to vector<192x64xbf16>
    %cst_16 = arith.constant dense<0.000000e+00> : vector<128x64xf32>
    %26 = tpu.matmul %23, %25, %cst_16 {dimension_numbers = #tpu.dot_dimension_numbers<[1], [0], [0], [1], [0, 0, 1, 1], [], []>} : vector<128x192xbf16>, vector<192x64xbf16>, vector<128x64xf32> -> vector<128x64xf32>
    %c0_17 = arith.constant 0 : index
    %c0_18 = arith.constant 0 : index
    %c0_19 = arith.constant 0 : index
    %27 = vector.load %arg5[%c0_17, %c0_18, %c0_19] : memref<4x1x64xf32, #tpu.memory_space<vmem>>, vector<1x1x64xf32>
    %28 = vector.shape_cast %27 : vector<1x1x64xf32> to vector<1x64xf32>
    %29 = vector.broadcast %28 : vector<1x64xf32> to vector<128x64xf32>
    %30 = arith.addf %26, %29 : vector<128x64xf32>
    %cst_20 = arith.constant 0.000000e+00 : f32
    %31 = vector.broadcast %cst_20 : f32 to vector<128x64xf32>
    %32 = arith.cmpf oge, %30, %31 : vector<128x64xf32>
    %cst_21 = arith.constant 2.000000e-01 : f32
    %33 = vector.broadcast %cst_21 : f32 to vector<128x64xf32>
    %34 = arith.mulf %33, %30 : vector<128x64xf32>
    %35 = arith.select %32, %30, %34 : vector<128x64xi1>, vector<128x64xf32>
    %c0_22 = arith.constant 0 : index
    %c0_23 = arith.constant 0 : index
    %36 = vector.load %arg11[%c0_22, %c0_23] : memref<256x64xf32, #tpu.memory_space<vmem>>, vector<128x64xf32>
    tpu.vector_store %arg11[%c0_22, %c0_23], %35 {strides = array<i32>} : memref<256x64xf32, #tpu.memory_space<vmem>>, vector<128x64xf32>,
    %c0_24 = arith.constant 0 : index
    %c0_25 = arith.constant 0 : index
    %37 = tpu.strided_load %arg11[%c0_24, %c0_25] {strides = array<i32: 2, 1>} : memref<256x64xf32, #tpu.memory_space<vmem>>, vector<64x64xf32>
    %c1_26 = arith.constant 1 : index
    %c0_27 = arith.constant 0 : index
    %38 = tpu.strided_load %arg11[%c1_26, %c0_27] {strides = array<i32: 2, 1>} : memref<256x64xf32, #tpu.memory_space<vmem>>, vector<64x64xf32>
    %cst_28 = arith.constant 0.000000e+00 : f32
    %39 = vector.broadcast %cst_28 : f32 to vector<1x64xf32>
    %40 = vector.extract_strided_slice %38 {offsets = [0, 0], sizes = [63, 64], strides = [1, 1]} : vector<64x64xf32> to vector<63x64xf32>
    %41 = tpu.concatenate %39, %40 in 0 : vector<1x64xf32>, vector<63x64xf32> -> vector<64x64xf32>
    %42 = tpu.iota {dimensions = array<i32: 0>} : vector<64x1xi32>
    %c7_i32 = arith.constant 7 : i32
    %43 = vector.broadcast %c7_i32 : i32 to vector<64x1xi32>
    %44 = arith.andi %42, %43 : vector<64x1xi32>
    %c0_i32_29 = arith.constant 0 : i32
    %45 = vector.broadcast %c0_i32_29 : i32 to vector<64x1xi32>
    %46 = arith.cmpi ne, %44, %45 : vector<64x1xi32>
    %cst_30 = arith.constant 0.000000e+00 : f32
    %47 = vector.shape_cast %46 : vector<64x1xi1> to vector<64x1xi1>
    %48 = vector.broadcast %47 : vector<64x1xi1> to vector<64x64xi1>
    %49 = vector.broadcast %cst_30 : f32 to vector<64x64xf32>
    %50 = arith.select %48, %41, %49 : vector<64x64xi1>, vector<64x64xf32>
    %51 = tpu.concatenate %50, %37, %38 in 1 : vector<64x64xf32>, vector<64x64xf32>, vector<64x64xf32> -> vector<64x192xf32>
    %52 = arith.truncf %51 : vector<64x192xf32> to vector<64x192xbf16>
    %c1_31 = arith.constant 1 : index
    %c0_32 = arith.constant 0 : index
    %c0_33 = arith.constant 0 : index
    %53 = vector.load %arg4[%c1_31, %c0_32, %c0_33] : memref<4x192x64xbf16, #tpu.memory_space<vmem>>, vector<1x192x64xbf16>
    %54 = vector.shape_cast %53 : vector<1x192x64xbf16> to vector<192x64xbf16>
    %cst_34 = arith.constant dense<0.000000e+00> : vector<64x64xf32>
    %55 = tpu.matmul %52, %54, %cst_34 {dimension_numbers = #tpu.dot_dimension_numbers<[1], [0], [0], [1], [0, 0, 1, 1], [], []>} : vector<64x192xbf16>, vector<192x64xbf16>, vector<64x64xf32> -> vector<64x64xf32>
    %c1_35 = arith.constant 1 : index
    %c0_36 = arith.constant 0 : index
    %c0_37 = arith.constant 0 : index
    %56 = vector.load %arg5[%c1_35, %c0_36, %c0_37] : memref<4x1x64xf32, #tpu.memory_space<vmem>>, vector<1x1x64xf32>
    %57 = vector.shape_cast %56 : vector<1x1x64xf32> to vector<1x64xf32>
    %58 = vector.broadcast %57 : vector<1x64xf32> to vector<64x64xf32>
    %59 = arith.addf %55, %58 : vector<64x64xf32>
    %cst_38 = arith.constant 0.000000e+00 : f32
    %60 = vector.broadcast %cst_38 : f32 to vector<64x64xf32>
    %61 = arith.cmpf oge, %59, %60 : vector<64x64xf32>
    %cst_39 = arith.constant 2.000000e-01 : f32
    %62 = vector.broadcast %cst_39 : f32 to vector<64x64xf32>
    %63 = arith.mulf %62, %59 : vector<64x64xf32>
    %64 = arith.select %61, %59, %63 : vector<64x64xi1>, vector<64x64xf32>
    %c0_40 = arith.constant 0 : index
    %c0_41 = arith.constant 0 : index
    %65 = vector.load %arg11[%c0_40, %c0_41] : memref<256x64xf32, #tpu.memory_space<vmem>>, vector<64x64xf32>
    tpu.vector_store %arg11[%c0_40, %c0_41], %64 {strides = array<i32>} : memref<256x64xf32, #tpu.memory_space<vmem>>, vector<64x64xf32>,
    %c0_42 = arith.constant 0 : index
    %c0_43 = arith.constant 0 : index
    %66 = tpu.strided_load %arg11[%c0_42, %c0_43] {strides = array<i32: 2, 1>} : memref<256x64xf32, #tpu.memory_space<vmem>>, vector<32x64xf32>
    %c1_44 = arith.constant 1 : index
    %c0_45 = arith.constant 0 : index
    %67 = tpu.strided_load %arg11[%c1_44, %c0_45] {strides = array<i32: 2, 1>} : memref<256x64xf32, #tpu.memory_space<vmem>>, vector<32x64xf32>
    %cst_46 = arith.constant 0.000000e+00 : f32
    %68 = vector.broadcast %cst_46 : f32 to vector<1x64xf32>
    %69 = vector.extract_strided_slice %67 {offsets = [0, 0], sizes = [31, 64], strides = [1, 1]} : vector<32x64xf32> to vector<31x64xf32>
    %70 = tpu.concatenate %68, %69 in 0 : vector<1x64xf32>, vector<31x64xf32> -> vector<32x64xf32>
    %71 = tpu.iota {dimensions = array<i32: 0>} : vector<32x1xi32>
    %c3_i32 = arith.constant 3 : i32
    %72 = vector.broadcast %c3_i32 : i32 to vector<32x1xi32>
    %73 = arith.andi %71, %72 : vector<32x1xi32>
    %c0_i32_47 = arith.constant 0 : i32
    %74 = vector.broadcast %c0_i32_47 : i32 to vector<32x1xi32>
    %75 = arith.cmpi ne, %73, %74 : vector<32x1xi32>
    %cst_48 = arith.constant 0.000000e+00 : f32
    %76 = vector.shape_cast %75 : vector<32x1xi1> to vector<32x1xi1>
    %77 = vector.broadcast %76 : vector<32x1xi1> to vector<32x64xi1>
    %78 = vector.broadcast %cst_48 : f32 to vector<32x64xf32>
    %79 = arith.select %77, %70, %78 : vector<32x64xi1>, vector<32x64xf32>
    %80 = tpu.concatenate %79, %66, %67 in 1 : vector<32x64xf32>, vector<32x64xf32>, vector<32x64xf32> -> vector<32x192xf32>
    %81 = arith.truncf %80 : vector<32x192xf32> to vector<32x192xbf16>
    %c2 = arith.constant 2 : index
    %c0_49 = arith.constant 0 : index
    %c0_50 = arith.constant 0 : index
    %82 = vector.load %arg4[%c2, %c0_49, %c0_50] : memref<4x192x64xbf16, #tpu.memory_space<vmem>>, vector<1x192x64xbf16>
    %83 = vector.shape_cast %82 : vector<1x192x64xbf16> to vector<192x64xbf16>
    %cst_51 = arith.constant dense<0.000000e+00> : vector<32x64xf32>
    %84 = tpu.matmul %81, %83, %cst_51 {dimension_numbers = #tpu.dot_dimension_numbers<[1], [0], [0], [1], [0, 0, 1, 1], [], []>} : vector<32x192xbf16>, vector<192x64xbf16>, vector<32x64xf32> -> vector<32x64xf32>
    %c2_52 = arith.constant 2 : index
    %c0_53 = arith.constant 0 : index
    %c0_54 = arith.constant 0 : index
    %85 = vector.load %arg5[%c2_52, %c0_53, %c0_54] : memref<4x1x64xf32, #tpu.memory_space<vmem>>, vector<1x1x64xf32>
    %86 = vector.shape_cast %85 : vector<1x1x64xf32> to vector<1x64xf32>
    %87 = vector.broadcast %86 : vector<1x64xf32> to vector<32x64xf32>
    %88 = arith.addf %84, %87 : vector<32x64xf32>
    %cst_55 = arith.constant 0.000000e+00 : f32
    %89 = vector.broadcast %cst_55 : f32 to vector<32x64xf32>
    %90 = arith.cmpf oge, %88, %89 : vector<32x64xf32>
    %cst_56 = arith.constant 2.000000e-01 : f32
    %91 = vector.broadcast %cst_56 : f32 to vector<32x64xf32>
    %92 = arith.mulf %91, %88 : vector<32x64xf32>
    %93 = arith.select %90, %88, %92 : vector<32x64xi1>, vector<32x64xf32>
    %c0_57 = arith.constant 0 : index
    %c0_58 = arith.constant 0 : index
    %94 = vector.load %arg11[%c0_57, %c0_58] : memref<256x64xf32, #tpu.memory_space<vmem>>, vector<32x64xf32>
    tpu.vector_store %arg11[%c0_57, %c0_58], %93 {strides = array<i32>} : memref<256x64xf32, #tpu.memory_space<vmem>>, vector<32x64xf32>,
    %c0_59 = arith.constant 0 : index
    %c0_60 = arith.constant 0 : index
    %95 = tpu.strided_load %arg11[%c0_59, %c0_60] {strides = array<i32: 2, 1>} : memref<256x64xf32, #tpu.memory_space<vmem>>, vector<16x64xf32>
    %c1_61 = arith.constant 1 : index
    %c0_62 = arith.constant 0 : index
    %96 = tpu.strided_load %arg11[%c1_61, %c0_62] {strides = array<i32: 2, 1>} : memref<256x64xf32, #tpu.memory_space<vmem>>, vector<16x64xf32>
    %cst_63 = arith.constant 0.000000e+00 : f32
    %97 = vector.broadcast %cst_63 : f32 to vector<1x64xf32>
    %98 = vector.extract_strided_slice %96 {offsets = [0, 0], sizes = [15, 64], strides = [1, 1]} : vector<16x64xf32> to vector<15x64xf32>
    %99 = tpu.concatenate %97, %98 in 0 : vector<1x64xf32>, vector<15x64xf32> -> vector<16x64xf32>
    %100 = tpu.iota {dimensions = array<i32: 0>} : vector<16x1xi32>
    %c1_i32 = arith.constant 1 : i32
    %101 = vector.broadcast %c1_i32 : i32 to vector<16x1xi32>
    %102 = arith.andi %100, %101 : vector<16x1xi32>
    %c0_i32_64 = arith.constant 0 : i32
    %103 = vector.broadcast %c0_i32_64 : i32 to vector<16x1xi32>
    %104 = arith.cmpi ne, %102, %103 : vector<16x1xi32>
    %cst_65 = arith.constant 0.000000e+00 : f32
    %105 = vector.shape_cast %104 : vector<16x1xi1> to vector<16x1xi1>
    %106 = vector.broadcast %105 : vector<16x1xi1> to vector<16x64xi1>
    %107 = vector.broadcast %cst_65 : f32 to vector<16x64xf32>
    %108 = arith.select %106, %99, %107 : vector<16x64xi1>, vector<16x64xf32>
    %109 = tpu.concatenate %108, %95, %96 in 1 : vector<16x64xf32>, vector<16x64xf32>, vector<16x64xf32> -> vector<16x192xf32>
    %110 = arith.truncf %109 : vector<16x192xf32> to vector<16x192xbf16>
    %c3 = arith.constant 3 : index
    %c0_66 = arith.constant 0 : index
    %c0_67 = arith.constant 0 : index
    %111 = vector.load %arg4[%c3, %c0_66, %c0_67] : memref<4x192x64xbf16, #tpu.memory_space<vmem>>, vector<1x192x64xbf16>
    %112 = vector.shape_cast %111 : vector<1x192x64xbf16> to vector<192x64xbf16>
    %cst_68 = arith.constant dense<0.000000e+00> : vector<16x64xf32>
    %113 = tpu.matmul %110, %112, %cst_68 {dimension_numbers = #tpu.dot_dimension_numbers<[1], [0], [0], [1], [0, 0, 1, 1], [], []>} : vector<16x192xbf16>, vector<192x64xbf16>, vector<16x64xf32> -> vector<16x64xf32>
    %c3_69 = arith.constant 3 : index
    %c0_70 = arith.constant 0 : index
    %c0_71 = arith.constant 0 : index
    %114 = vector.load %arg5[%c3_69, %c0_70, %c0_71] : memref<4x1x64xf32, #tpu.memory_space<vmem>>, vector<1x1x64xf32>
    %115 = vector.shape_cast %114 : vector<1x1x64xf32> to vector<1x64xf32>
    %116 = vector.broadcast %115 : vector<1x64xf32> to vector<16x64xf32>
    %117 = arith.addf %113, %116 : vector<16x64xf32>
    %cst_72 = arith.constant 0.000000e+00 : f32
    %118 = vector.broadcast %cst_72 : f32 to vector<16x64xf32>
    %119 = arith.cmpf oge, %117, %118 : vector<16x64xf32>
    %cst_73 = arith.constant 2.000000e-01 : f32
    %120 = vector.broadcast %cst_73 : f32 to vector<16x64xf32>
    %121 = arith.mulf %120, %117 : vector<16x64xf32>
    %122 = arith.select %119, %117, %121 : vector<16x64xi1>, vector<16x64xf32>
    %c0_74 = arith.constant 0 : index
    %c0_75 = arith.constant 0 : index
    %123 = vector.load %arg11[%c0_74, %c0_75] : memref<256x64xf32, #tpu.memory_space<vmem>>, vector<16x64xf32>
    tpu.vector_store %arg11[%c0_74, %c0_75], %122 {strides = array<i32>} : memref<256x64xf32, #tpu.memory_space<vmem>>, vector<16x64xf32>,
    %c0_76 = arith.constant 0 : index
    %c0_77 = arith.constant 0 : index
    %124 = tpu.strided_load %arg11[%c0_76, %c0_77] {strides = array<i32: 2, 1>} : memref<256x64xf32, #tpu.memory_space<vmem>>, vector<8x64xf32>
    %c1_78 = arith.constant 1 : index
    %c0_79 = arith.constant 0 : index
    %125 = tpu.strided_load %arg11[%c1_78, %c0_79] {strides = array<i32: 2, 1>} : memref<256x64xf32, #tpu.memory_space<vmem>>, vector<8x64xf32>
    %126 = tpu.concatenate %124, %125 in 1 : vector<8x64xf32>, vector<8x64xf32> -> vector<8x128xf32>
    %127 = arith.truncf %126 : vector<8x128xf32> to vector<8x128xbf16>
    %c0_80 = arith.constant 0 : index
    %c0_81 = arith.constant 0 : index
    %128 = vector.load %arg6[%c0_80, %c0_81] : memref<128x64xbf16, #tpu.memory_space<vmem>>, vector<128x64xbf16>
    %cst_82 = arith.constant dense<0.000000e+00> : vector<8x64xf32>
    %129 = tpu.matmul %127, %128, %cst_82 {dimension_numbers = #tpu.dot_dimension_numbers<[1], [0], [0], [1], [0, 0, 1, 1], [], []>} : vector<8x128xbf16>, vector<128x64xbf16>, vector<8x64xf32> -> vector<8x64xf32>
    %c0_83 = arith.constant 0 : index
    %c0_84 = arith.constant 0 : index
    %130 = vector.load %arg7[%c0_83, %c0_84] : memref<1x64xf32, #tpu.memory_space<vmem>>, vector<1x64xf32>
    %131 = vector.broadcast %130 : vector<1x64xf32> to vector<8x64xf32>
    %132 = arith.addf %129, %131 : vector<8x64xf32>
    %cst_85 = arith.constant 0.000000e+00 : f32
    %133 = vector.broadcast %cst_85 : f32 to vector<8x64xf32>
    %134 = arith.cmpf oge, %132, %133 : vector<8x64xf32>
    %cst_86 = arith.constant 2.000000e-01 : f32
    %135 = vector.broadcast %cst_86 : f32 to vector<8x64xf32>
    %136 = arith.mulf %135, %132 : vector<8x64xf32>
    %137 = arith.select %134, %132, %136 : vector<8x64xi1>, vector<8x64xf32>
    %138 = arith.truncf %137 : vector<8x64xf32> to vector<8x64xbf16>
    %c0_87 = arith.constant 0 : index
    %c0_88 = arith.constant 0 : index
    %139 = vector.load %arg8[%c0_87, %c0_88] : memref<64x64xbf16, #tpu.memory_space<vmem>>, vector<64x64xbf16>
    %cst_89 = arith.constant dense<0.000000e+00> : vector<8x64xf32>
    %140 = tpu.matmul %138, %139, %cst_89 {dimension_numbers = #tpu.dot_dimension_numbers<[1], [0], [0], [1], [0, 0, 1, 1], [], []>} : vector<8x64xbf16>, vector<64x64xbf16>, vector<8x64xf32> -> vector<8x64xf32>
    %c0_90 = arith.constant 0 : index
    %c0_91 = arith.constant 0 : index
    %141 = vector.load %arg9[%c0_90, %c0_91] : memref<1x64xf32, #tpu.memory_space<vmem>>, vector<1x64xf32>
    %142 = vector.broadcast %141 : vector<1x64xf32> to vector<8x64xf32>
    %143 = arith.addf %140, %142 : vector<8x64xf32>
    %c0_92 = arith.constant 0 : index
    %c0_93 = arith.constant 0 : index
    %144 = vector.load %arg10[%c0_92, %c0_93] : memref<8x64xf32, #tpu.memory_space<vmem>>, vector<8x64xf32>
    tpu.vector_store %arg10[%c0_92, %c0_93], %143 {strides = array<i32>} : memref<8x64xf32, #tpu.memory_space<vmem>>, vector<8x64xf32>,
    return
  }
  func.func @transform_0(%arg0: i32) -> (i32, i32, i32) {
    %c0_i32 = arith.constant 0 : i32
    %c0_i32_0 = arith.constant 0 : i32
    %c0_i32_1 = arith.constant 0 : i32
    return %arg0, %c0_i32, %c0_i32_0 : i32, i32, i32
  }
  func.func @transform_1(%arg0: i32) -> (i32, i32) {
    %c0_i32 = arith.constant 0 : i32
    %c0_i32_0 = arith.constant 0 : i32
    %c0_i32_1 = arith.constant 0 : i32
    return %c0_i32, %c0_i32_0 : i32, i32
  }
  func.func @transform_2(%arg0: i32) -> (i32, i32) {
    %c0_i32 = arith.constant 0 : i32
    %c0_i32_0 = arith.constant 0 : i32
    %c0_i32_1 = arith.constant 0 : i32
    return %c0_i32, %c0_i32_0 : i32, i32
  }
  func.func @transform_3(%arg0: i32) -> (i32, i32, i32) {
    %c0_i32 = arith.constant 0 : i32
    %c0_i32_0 = arith.constant 0 : i32
    %c0_i32_1 = arith.constant 0 : i32
    %c0_i32_2 = arith.constant 0 : i32
    return %c0_i32, %c0_i32_0, %c0_i32_1 : i32, i32, i32
  }
  func.func @transform_4(%arg0: i32) -> (i32, i32, i32) {
    %c0_i32 = arith.constant 0 : i32
    %c0_i32_0 = arith.constant 0 : i32
    %c0_i32_1 = arith.constant 0 : i32
    %c0_i32_2 = arith.constant 0 : i32
    return %c0_i32, %c0_i32_0, %c0_i32_1 : i32, i32, i32
  }
  func.func @transform_5(%arg0: i32) -> (i32, i32) {
    %c0_i32 = arith.constant 0 : i32
    %c0_i32_0 = arith.constant 0 : i32
    %c0_i32_1 = arith.constant 0 : i32
    return %c0_i32, %c0_i32_0 : i32, i32
  }
  func.func @transform_6(%arg0: i32) -> (i32, i32) {
    %c0_i32 = arith.constant 0 : i32
    %c0_i32_0 = arith.constant 0 : i32
    %c0_i32_1 = arith.constant 0 : i32
    return %c0_i32, %c0_i32_0 : i32, i32
  }
  func.func @transform_7(%arg0: i32) -> (i32, i32) {
    %c0_i32 = arith.constant 0 : i32
    %c0_i32_0 = arith.constant 0 : i32
    %c0_i32_1 = arith.constant 0 : i32
    return %c0_i32, %c0_i32_0 : i32, i32
  }
  func.func @transform_8(%arg0: i32) -> (i32, i32) {
    %c0_i32 = arith.constant 0 : i32
    %c0_i32_0 = arith.constant 0 : i32
    %c0_i32_1 = arith.constant 0 : i32
    return %c0_i32, %c0_i32_0 : i32, i32
  }
  func.func @transform_9(%arg0: i32) -> (i32, i32) {
    %c0_i32 = arith.constant 0 : i32
    %c0_i32_0 = arith.constant 0 : i32
    return %arg0, %c0_i32 : i32, i32
  }
}

</mosaic_0001>

<bundles_post_ra>
// kernel: tpu_custom_call.1
= control target key start
LH: loop header
LB: loop body
LE: loop exit
PB: predicated region body
PF: predicated region fallthrough
CT: control target
= control target key end

     0   :  { %14 = vsyncpa [#allocation4], 0  ;;  %s4758_s0 = inlined_call_operand.vmem [shape: bf16[16,32,512], index: 0, kind: input, shape index: {}]   ;;  %s4759_s1 = inlined_call_operand.vmem [shape: bf16[512,64], index: 1, kind: input, shape index: {}]   ;;  %s4760_s2 = inlined_call_operand.vmem [shape: f32[1,64], index: 2, kind: input, shape index: {}]   ;;  %s4761_s3 = inlined_call_operand.vmem [shape: bf16[4,192,64], index: 3, kind: input, shape index: {}]   ;;  %s4762_s4 = inlined_call_operand.vmem [shape: f32[4,1,64], index: 4, kind: input, shape index: {}]   ;;  %s4763_s5 = inlined_call_operand.vmem [shape: bf16[128,64], index: 5, kind: input, shape index: {}]   ;;  %s4764_s6 = inlined_call_operand.vmem [shape: f32[1,64], index: 6, kind: input, shape index: {}]   ;;  %s4765_s7 = inlined_call_operand.vmem [shape: bf16[64,64], index: 7, kind: input, shape index: {}]   ;;  %s4766_s8 = inlined_call_operand.vmem [shape: f32[1,64], index: 8, kind: input, shape index: {}]   ;;  %s4767_s9 = inlined_call_operand.hbm [shape: f32[16,64], index: 9, kind: output, shape index: {}]  }
   0x1   :  { %16 = vsyncpa [#allocation4 + $0x1], 0  ;;  %s3972_s30 = smov 0   ;;  %s3974_s10 = smov 0  }
   0x2   :  { %s3976_s11 = smov 0   ;;  %s3978_s12 = smov 0  }
   0x3 LB: > { %s3993_s13 = sadd.s32 4294967295, %s3915_s12   ;;  %s3012_s14 = sadd.s32 4294967294, %s3915_s12   ;;  %s3915_s12 = sphi %s3978_s12, %s4773_s12   ;;  %s3911_s11 = sphi %s3976_s11, %s4772_s11   ;;  %s3907_s10 = sphi %s3974_s10, %s4771_s10   ;;  %s3903_s30 = sphi %s3972_s30, %s4770_s30  }
   0x4   : > { %s3997_s15 = sadd.s32 1, %s3915_s12   ;;  %s223_s16 = sadd.s32 1, %s3911_s11 }
   0x5   : > { %s220_s17 = ssub.s32 %s3915_s12, %s3997_s15  ;;  %p233_p0 = scmp.ne.s32.totalorder %s3911_s11, %s3907_s10 }
   0x6   : > { %p221_p1 = scmp.eq.s32.totalorder %s220_s17, 0  ;;  %p234_p2 = scmp.eq.s32.totalorder %s3993_s13, 1 }
   0x7   : > { %p239_p3 = scmp.ne.s32.totalorder %s3907_s10, %s3903_s30  ;;  %p240_p4 = scmp.eq.s32.totalorder %s3012_s14, 1 }
   0x8   : > { %s4008_s18 = scalar_select %p221_p1, %s3911_s11, %s223_s16  }
   0x9   : > { %p4010_p5 = por %p234_p2, %p233_p0  ;;  %p4014_p6 = por %p240_p4, %p239_p3 }
   0xa   : > { %p3015_p7 = scmp.ge.s32.totalorder %s3915_s12, 1  ;;  %p292_p8 = scmp.lt.s32.totalorder %s3915_s12, 3 }
   0xc   : > { %p293_p9 = pnand %p3015_p7, %p292_p8 }
   0xd   : > { %s3017_s29 = sshll.u32 (!%p293_p9), %s3993_s13, 3  ;;  %s3918_s22 = smov (!%p293_p9), 64  }
   0xe   : > { %296 = sbr.rel (%p293_p9) target bundleno = 2241 (0x8c1), region = 56  ;;  %p330_p10 = scmp.lt.s32.totalorder (!%p293_p9), %s3017_s29, 15 }
   0xf   : > { %s326_s28 = sand.u32 (!%p293_p9), 1, %s3907_s10   ;;  %s3275_s21 = sshll.u32 (!%p293_p9), %s3993_s13, 7 }
  0x10   : > { %s3016_s16 = sshll.u32 (!%p293_p9), %s326_s28, 3 }
  0x11   : > { %s328_s23 = scalar_lea.vmem (!%p293_p9), [#allocation3], %s3016_s16 }
  0x12   : > { %s2953_s24 = sshll.u32 (!%p293_p9), %s328_s23, 4  ;;  %s4718_s24 = int_to_ptr.vmem [resolvable:$true] %s2953_s24 }
  0x13   : > { %v3667_v0 = vld [vmem:[%s4759_s1 + $0x78] sm:$0xff]   ;;  %v3671_v4 = vld [vmem:[%s4759_s1 + $0x70] sm:$0xff]   ;;  %v3675_v8 = vld [vmem:[%s4759_s1 + $0x68] sm:$0xff]   ;;  %s4775_s29 = smov (!%p330_p10, %s3017_s29), 15  ;;  %vm1306_vm0 = vcmask 523264   ;;  %vm1418_vm1 = vcmask 1040384  }
  0x14   : > { %v3668_v1 = vld [vmem:[%s4759_s1 + $0xf8] sm:$0xff]   ;;  %3279 = vmatprep.subr.bf16.mxu0 %v3667_v0  ;;  %v3672_v5 = vld [vmem:[%s4759_s1 + $0xf0] sm:$0xff]   ;;  %v3676_v9 = vld [vmem:[%s4759_s1 + $0xe8] sm:$0xff]   ;;  %s3278_s14 = sshll.u32 %s4775_s29, 6  ;;  %s3855_s13 = scalar_lea.vmem %s4718_s24, 128 }
  0x15   : > { %v3669_v2 = vld [vmem:[%s4759_s1 + $0x38] sm:$0xff]   ;;  %3391 = vmatprep.subr.bf16.mxu1 %v3668_v1  ;;  %v3673_v6 = vld [vmem:[%s4759_s1 + $0x30] sm:$0xff]   ;;  %v3677_v10 = vld [vmem:[%s4759_s1 + $0x28] sm:$0xff]   ;;  %s4114_s27 = scalar_lea.vmem %s4758_s0, %s3278_s14  ;;  %p3856_p11 = scmp.ne.s32.totalorder %s4718_s24, %s3855_s13 }
  0x16   : > { %v3670_v3 = vld [vmem:[%s4759_s1 + $0xb8] sm:$0xff]   ;;  %3280 = vmatpush3.bf16.msra.mxu0 %v3669_v2  ;;  %v3674_v7 = vld [vmem:[%s4759_s1 + $0xb0] sm:$0xff]   ;;  %v3678_v11 = vld [vmem:[%s4759_s1 + $0xa8] sm:$0xff]   ;;  %s3921_s29 = smov [#allocation3]  }
  0x17   : > { %3392 = vmatpush3.bf16.msra.mxu1 %v3670_v3  ;;  %3281 = vmatprep.subr.bf16.mxu0 %v3671_v4  ;;  %v3679_v12 = vld [vmem:[%s4759_s1 + $0x60] sm:$0xff]   ;;  %v3683_v16 = vld [vmem:[%s4759_s1 + $0x58] sm:$0xff]   ;;  %v3687_v20 = vld [vmem:[%s4759_s1 + $0x50] sm:$0xff]   ;;  %p3857_p12 = pnand %p3856_p11, %p4010_p5  ;;  %s3859_s16 = sshll.u32 %s3921_s29, 4  ;;  %s3860_s16 = int_to_ptr.vmem [resolvable:$false] %s3859_s16 }
  0x18   : > { %3393 = vmatprep.subr.bf16.mxu1 %v3672_v5  ;;  %v3680_v13 = vld [vmem:[%s4759_s1 + $0xe0] sm:$0xff]   ;;  %v3684_v17 = vld [vmem:[%s4759_s1 + $0xd8] sm:$0xff]   ;;  %v3688_v21 = vld [vmem:[%s4759_s1 + $0xd0] sm:$0xff]   ;;  %s3861_s17 = scalar_lea.vmem %s3860_s16, 256  ;;  %p3862_p0 = scmp.lt.s32.totalorder %s4718_s24, %s3860_s16 }
  0x19   : > { %v3681_v14 = vld [vmem:[%s4759_s1 + $0x20] sm:$0xff]   ;;  %v3685_v18 = vld [vmem:[%s4759_s1 + $0x18] sm:$0xff]   ;;  %v3689_v22 = vld [vmem:[%s4759_s1 + $0x10] sm:$0xff]   ;;  %p3858_p13 = pneg %p3857_p12  ;;  %p3863_p1 = scmp.lt.s32.totalorder %s3861_s17, %s3855_s13 }
  0x1a   : > { %3282 = vmatpush3.bf16.msra.mxu0 %v3673_v6  ;;  %v3682_v15 = vld [vmem:[%s4759_s1 + $0xa0] sm:$0xff]   ;;  %v3686_v19 = vld [vmem:[%s4759_s1 + $0x98] sm:$0xff]   ;;  %v3690_v23 = vld [vmem:[%s4759_s1 + $0x90] sm:$0xff]  }
  0x1b   : > { %3394 = vmatpush3.bf16.msra.mxu1 %v3674_v7  ;;  %3283 = vmatprep.subr.bf16.mxu0 %v3675_v8  ;;  %v3691_v24 = vld [vmem:[%s4759_s1 + $0x48] sm:$0xff]   ;;  %v3695_v28 = vld [vmem:[%s4759_s1 + $0x40] sm:$0xff]   ;;  %p3864_p2 = por %p3863_p1, %p3862_p0 }
  0x1c   : > { %3395 = vmatprep.subr.bf16.mxu1 %v3676_v9  ;;  %v3692_v25 = vld [vmem:[%s4759_s1 + $0xc8] sm:$0xff]   ;;  %v3696_v29 = vld [vmem:[%s4759_s1 + $0xc0] sm:$0xff]  }
  0x1d   : > { %v3693_v26 = vld [vmem:[%s4759_s1 + $0x8] sm:$0xff]   ;;  %v3697_v30 = vld [vmem:[%s4759_s1] sm:$0xff]   ;;  %p3865_p3 = pnand %p3864_p2, %p3858_p13 }
  0x1e   : > { %3284 = vmatpush3.bf16.msra.mxu0 %v3677_v10  ;;  %v3694_v27 = vld [vmem:[%s4759_s1 + $0x88] sm:$0xff]   ;;  %v3698_v31 = vld [vmem:[%s4759_s1 + $0x80] sm:$0xff]  }
  0x1f   : > { %3396 = vmatpush3.bf16.msra.mxu1 %v3678_v11  ;;  %3285 = vmatprep.subr.bf16.mxu0 %v3679_v12  ;;  %v3699_v32 = vld [vmem:[%s4114_s27] ss:$16 sps:$4 sm:$0xff]   ;;  %v3701_v33 = vld [vmem:[%s4114_s27 + $0x4] ss:$16 sps:$4 sm:$0xff]   ;;  %v3702_v34 = vld [vmem:[%s4114_s27 + $0x8] ss:$16 sps:$4 sm:$0xff]  }
  0x20   : > { %3397 = vmatprep.subr.bf16.mxu1 %v3680_v13  ;;  %v3704_v35 = vld [vmem:[%s4114_s27 + $0xc] ss:$16 sps:$4 sm:$0xff]   ;;  %1016 = vmatprep.mubr.bf16.mxu0 %v3701_v33  ;;  %v3705_v36 = vld [vmem:[%s4114_s27 + $0x24] ss:$16 sps:$4 sm:$0xff]   ;;  %v3709_v38 = vld [vmem:[%s4114_s27 + $0x20] ss:$16 sps:$4 sm:$0xff]  }
  0x21   : > { %1177 = vmatprep.mubr.bf16.mxu1 %v3704_v35  ;;  %v3707_v37 = vld [vmem:[%s4114_s27 + $0x2c] ss:$16 sps:$4 sm:$0xff]   ;;  %v3710_v39 = vld [vmem:[%s4114_s27 + $0x28] ss:$16 sps:$4 sm:$0xff]   ;;  %v3711_v40 = vld [vmem:[%s4114_s27 + $0x44] ss:$16 sps:$4 sm:$0xff]  }
  0x22   : > { %3286 = vmatpush3.bf16.msra.mxu0 %v3681_v14  ;;  %v3713_v41 = vld [vmem:[%s4114_s27 + $0x4c] ss:$16 sps:$4 sm:$0xff]   ;;  %v3715_v42 = vld [vmem:[%s4114_s27 + $0x40] ss:$16 sps:$4 sm:$0xff]   ;;  %v3716_v43 = vld [vmem:[%s4114_s27 + $0x48] ss:$16 sps:$4 sm:$0xff]  }
  0x23   : > { %3398 = vmatpush3.bf16.msra.mxu1 %v3682_v15  ;;  %3287 = vmatprep.subr.bf16.mxu0 %v3683_v16  ;;  %v3717_v44 = vld [vmem:[%s4114_s27 + $0x64] ss:$16 sps:$4 sm:$0xff]   ;;  %v3719_v45 = vld [vmem:[%s4114_s27 + $0x6c] ss:$16 sps:$4 sm:$0xff]   ;;  %v3721_v46 = vld [vmem:[%s4114_s27 + $0x60] ss:$16 sps:$4 sm:$0xff]  }
  0x24   : > { %3399 = vmatprep.subr.bf16.mxu1 %v3684_v17  ;;  %v3722_v47 = vld [vmem:[%s4114_s27 + $0x68] ss:$16 sps:$4 sm:$0xff]   ;;  %v3723_v48 = vld [vmem:[%s4114_s27 + $0x84] ss:$16 sps:$4 sm:$0xff]   ;;  %v3725_v49 = vld [vmem:[%s4114_s27 + $0x8c] ss:$16 sps:$4 sm:$0xff]  }
  0x25   : > { %v3727_v50 = vld [vmem:[%s4114_s27 + $0x80] ss:$16 sps:$4 sm:$0xff]   ;;  %v3728_v51 = vld [vmem:[%s4114_s27 + $0x88] ss:$16 sps:$4 sm:$0xff]   ;;  %v3729_v52 = vld [vmem:[%s4114_s27 + $0xa4] ss:$16 sps:$4 sm:$0xff]  }
  0x26   : > { %3288 = vmatpush3.bf16.msra.mxu0 %v3685_v18  ;;  %v3731_v53 = vld [vmem:[%s4114_s27 + $0xac] ss:$16 sps:$4 sm:$0xff]   ;;  %v3733_v54 = vld [vmem:[%s4114_s27 + $0xa0] ss:$16 sps:$4 sm:$0xff]   ;;  %v3734_v55 = vld [vmem:[%s4114_s27 + $0xa8] ss:$16 sps:$4 sm:$0xff]  }
  0x27   : > { %3400 = vmatpush3.bf16.msra.mxu1 %v3686_v19  ;;  %3289 = vmatprep.subr.bf16.mxu0 %v3687_v20  ;;  %v3735_v56 = vld [vmem:[%s4114_s27 + $0xc4] ss:$16 sps:$4 sm:$0xff]   ;;  %v3737_v57 = vld [vmem:[%s4114_s27 + $0xcc] ss:$16 sps:$4 sm:$0xff]   ;;  %v3739_v58 = vld [vmem:[%s4114_s27 + $0xc0] ss:$16 sps:$4 sm:$0xff]  }
  0x28   : > { %3401 = vmatprep.subr.bf16.mxu1 %v3688_v21  ;;  %v3740_v59 = vld [vmem:[%s4114_s27 + $0xc8] ss:$16 sps:$4 sm:$0xff]   ;;  %v3741_v60 = vld [vmem:[%s4114_s27 + $0xe4] ss:$16 sps:$4 sm:$0xff]   ;;  %v3743_v61 = vld [vmem:[%s4114_s27 + $0xec] ss:$16 sps:$4 sm:$0xff]  }
  0x29   : > { %v3745_v62 = vld [vmem:[%s4114_s27 + $0xe0] ss:$16 sps:$4 sm:$0xff]   ;;  %v3746_v63 = vld [vmem:[%s4114_s27 + $0xe8] ss:$16 sps:$4 sm:$0xff]   ;;  %v3747_v0 = vld [vmem:[%s4114_s27 + $0x104] ss:$16 sps:$4 sm:$0xff]  }
  0x2a   : > { %3290 = vmatpush3.bf16.msra.mxu0 %v3689_v22  ;;  %v3749_v1 = vld [vmem:[%s4114_s27 + $0x10c] ss:$16 sps:$4 sm:$0xff]   ;;  %v3751_v2 = vld [vmem:[%s4114_s27 + $0x100] ss:$16 sps:$4 sm:$0xff]   ;;  %v3752_v3 = vld [vmem:[%s4114_s27 + $0x108] ss:$16 sps:$4 sm:$0xff]  }
  0x2b   : > { %3402 = vmatpush3.bf16.msra.mxu1 %v3690_v23  ;;  %3291 = vmatprep.subr.bf16.mxu0 %v3691_v24  ;;  %v3753_v4 = vld [vmem:[%s4114_s27 + $0x124] ss:$16 sps:$4 sm:$0xff]   ;;  %v3755_v5 = vld [vmem:[%s4114_s27 + $0x12c] ss:$16 sps:$4 sm:$0xff]   ;;  %v3757_v6 = vld [vmem:[%s4114_s27 + $0x120] ss:$16 sps:$4 sm:$0xff]  }
  0x2c   : > { %3403 = vmatprep.subr.bf16.mxu1 %v3692_v25  ;;  %v3758_v7 = vld [vmem:[%s4114_s27 + $0x128] ss:$16 sps:$4 sm:$0xff]   ;;  %v3759_v8 = vld [vmem:[%s4114_s27 + $0x144] ss:$16 sps:$4 sm:$0xff]   ;;  %v3761_v9 = vld [vmem:[%s4114_s27 + $0x14c] ss:$16 sps:$4 sm:$0xff]  }
  0x2d   : > { %v3763_v10 = vld [vmem:[%s4114_s27 + $0x140] ss:$16 sps:$4 sm:$0xff]   ;;  %v3764_v11 = vld [vmem:[%s4114_s27 + $0x148] ss:$16 sps:$4 sm:$0xff]   ;;  %v3765_v12 = vld [vmem:[%s4114_s27 + $0x164] ss:$16 sps:$4 sm:$0xff]  }
  0x2e   : > { %3292 = vmatpush3.bf16.msra.mxu0 %v3693_v26  ;;  %v3767_v13 = vld [vmem:[%s4114_s27 + $0x16c] ss:$16 sps:$4 sm:$0xff]   ;;  %v3769_v14 = vld [vmem:[%s4114_s27 + $0x160] ss:$16 sps:$4 sm:$0xff]   ;;  %v3770_v15 = vld [vmem:[%s4114_s27 + $0x168] ss:$16 sps:$4 sm:$0xff]  }
  0x2f   : > { %3404 = vmatpush3.bf16.msra.mxu1 %v3694_v27  ;;  %3293 = vmatprep.subr.bf16.mxu0 %v3695_v28  ;;  %v3771_v16 = vld [vmem:[%s4114_s27 + $0x184] ss:$16 sps:$4 sm:$0xff]   ;;  %v3773_v17 = vld [vmem:[%s4114_s27 + $0x18c] ss:$16 sps:$4 sm:$0xff]   ;;  %v3775_v18 = vld [vmem:[%s4114_s27 + $0x180] ss:$16 sps:$4 sm:$0xff]  }
  0x30   : > { %3405 = vmatprep.subr.bf16.mxu1 %v3696_v29  ;;  %v3776_v19 = vld [vmem:[%s4114_s27 + $0x188] ss:$16 sps:$4 sm:$0xff]   ;;  %v3777_v20 = vld [vmem:[%s4114_s27 + $0x1a4] ss:$16 sps:$4 sm:$0xff]   ;;  %v3779_v21 = vld [vmem:[%s4114_s27 + $0x1ac] ss:$16 sps:$4 sm:$0xff]  }
  0x31   : > { %v3781_v22 = vld [vmem:[%s4114_s27 + $0x1a0] ss:$16 sps:$4 sm:$0xff]   ;;  %v3782_v23 = vld [vmem:[%s4114_s27 + $0x1a8] ss:$16 sps:$4 sm:$0xff]   ;;  %v3783_v24 = vld [vmem:[%s4114_s27 + $0x1c4] ss:$16 sps:$4 sm:$0xff]  }
  0x32   : > { %3294 = vmatpush3.bf16.msra.mxu0 %v3697_v30  ;;  %v3785_v25 = vld [vmem:[%s4114_s27 + $0x1cc] ss:$16 sps:$4 sm:$0xff]   ;;  %v3787_v26 = vld [vmem:[%s4114_s27 + $0x1c0] ss:$16 sps:$4 sm:$0xff]   ;;  %v3788_v27 = vld [vmem:[%s4114_s27 + $0x1c8] ss:$16 sps:$4 sm:$0xff]  }
  0x33   : > { %3406 = vmatpush3.bf16.msra.mxu1 %v3698_v31  ;;  %v3789_v28 = vld [vmem:[%s4114_s27 + $0x1e4] ss:$16 sps:$4 sm:$0xff]   ;;  %v3791_v29 = vld [vmem:[%s4114_s27 + $0x1ec] ss:$16 sps:$4 sm:$0xff]   ;;  %v3793_v30 = vld [vmem:[%s4114_s27 + $0x1e0] ss:$16 sps:$4 sm:$0xff]  }
  0x34   : > { %v3794_v31 = vld [vmem:[%s4114_s27 + $0x1e8] ss:$16 sps:$4 sm:$0xff]   ;;  %v3917_v33 = vmov 0   ;;  %s4716_s27 = scalar_lea.hbm %s4767_s9, %s3275_s21 }
  0x35   : > { %1017 = vmatmul.mubr.bf16.vlgmr.msra.gmra.mxu0 %v3699_v32  ;;  %v3795_v32 = vld [vmem:[%s4761_s3 + $0x38] sm:$0xff]   ;;  %1787 = vmatprep.subr.bf16.mxu0 %v3917_v33  ;;  %v3797_v35 = vld [vmem:[%s4761_s3 + $0x28] sm:$0xff]  }
  0x36   : > { %1178 = vmatmul.mubr.bf16.vlgmr.msra.gmra.mxu1 %v3702_v34  ;;  %1024 = vmatprep.mubr.bf16.mxu0 %v3705_v36  ;;  %v3796_v34 = vld [vmem:[%s4761_s3 + $0x30] sm:$0xff]   ;;  %v3798_v36 = vld [vmem:[%s4761_s3 + $0x20] sm:$0xff]  }
  0x37   : > { %1185 = vmatprep.mubr.bf16.mxu1 %v3707_v37  ;;  %2201 = vmatprep.subr.bf16.mxu1 %v3917_v33  ;;  %v3799_v37 = vld [vmem:[%s4761_s3 + $0x18] sm:$0xff]  }
  0x38   : > { %1788 = vmatpush1.bf16.msra.mxu0 %v3795_v32 }
  0x39   : > { %1789 = vmatprep.subr.bf16.mxu0 %v3917_v33 }
  0x3c   : > { %1790 = vmatpush1.bf16.msra.mxu0 %v3796_v34 }
  0x3d   : > { %1025 = vmatmul.mubr.bf16.gmra.mxu0 %v3709_v38  ;;  %1791 = vmatprep.subr.bf16.mxu0 %v3917_v33  ;;  %v3800_v38 = vld [vmem:[%s4761_s3 + $0x10] sm:$0xff]  }
  0x3e   : > { %1186 = vmatmul.mubr.bf16.gmra.mxu1 %v3710_v39  ;;  %1032 = vmatprep.mubr.bf16.mxu0 %v3711_v40  ;;  %v3801_v39 = vld [vmem:[%s4761_s3 + $0x8] sm:$0xff]  }
  0x3f   : > { %1193 = vmatprep.mubr.bf16.mxu1 %v3713_v41 }
  0x40   : > { %1792 = vmatpush1.bf16.msra.mxu0 %v3797_v35 }
  0x41   : > { %1793 = vmatprep.subr.bf16.mxu0 %v3917_v33 }
  0x44   : > { %1794 = vmatpush1.bf16.msra.mxu0 %v3798_v36 }
  0x45   : > { %1033 = vmatmul.mubr.bf16.gmra.mxu0 %v3715_v42  ;;  %1795 = vmatprep.subr.bf16.mxu0 %v3917_v33  ;;  %v4218_v42 = vld [vmem:[%s4760_s2] ss:$0 sm:$0xff] }
  0x46   : > { %1194 = vmatmul.mubr.bf16.gmra.mxu1 %v3716_v43  ;;  %1040 = vmatprep.mubr.bf16.mxu0 %v3717_v44 }
  0x47   : > { %1201 = vmatprep.mubr.bf16.mxu1 %v3719_v45 }
  0x48   : > { %1796 = vmatpush1.bf16.msra.mxu0 %v3799_v37 }
  0x49   : > { %1797 = vmatprep.subr.bf16.mxu0 %v3917_v33 }
  0x4c   : > { %1798 = vmatpush1.bf16.msra.mxu0 %v3800_v38 }
  0x4d   : > { %1041 = vmatmul.mubr.bf16.gmra.mxu0 %v3721_v46  ;;  %1799 = vmatprep.subr.bf16.mxu0 %v3917_v33  ;;  %v3802_v46 = vld [vmem:[%s4761_s3] sm:$0xff]  }
  0x4e   : > { %1202 = vmatmul.mubr.bf16.gmra.mxu1 %v3722_v47  ;;  %1048 = vmatprep.mubr.bf16.mxu0 %v3723_v48 }
  0x4f   : > { %1209 = vmatprep.mubr.bf16.mxu1 %v3725_v49 }
  0x50   : > { %1800 = vmatpush1.bf16.msra.mxu0 %v3801_v39 }
  0x51   : > { %1801 = vmatprep.subr.bf16.mxu0 %v3917_v33 }
  0x54   : > { %1802 = vmatpush1.bf16.msra.mxu0 %v3802_v46 }
  0x55   : > { %1049 = vmatmul.mubr.bf16.gmra.mxu0 %v3727_v50  ;;  %1811 = vmatprep.subr.bf16.mxu0 %v3917_v33 }
  0x56   : > { %1210 = vmatmul.mubr.bf16.gmra.mxu1 %v3728_v51  ;;  %1056 = vmatprep.mubr.bf16.mxu0 %v3729_v52  ;;  %v3803_v51 = vld [vmem:[%s4761_s3 + $0x58] sm:$0xff]  }
  0x57   : > { %1217 = vmatprep.mubr.bf16.mxu1 %v3731_v53 }
  0x58   : > { %1812 = vmatpush2.bf16.msra.mxu0 %v3803_v51 }
  0x59   : > { %1813 = vmatprep.subr.bf16.mxu0 %v3917_v33 }
  0x5d   : > { %1057 = vmatmul.mubr.bf16.gmra.mxu0 %v3733_v54 }
  0x5e   : > { %1218 = vmatmul.mubr.bf16.gmra.mxu1 %v3734_v55  ;;  %1064 = vmatprep.mubr.bf16.mxu0 %v3735_v56 }
  0x5f   : > { %1225 = vmatprep.mubr.bf16.mxu1 %v3737_v57 }
  0x65   : > { %1065 = vmatmul.mubr.bf16.gmra.mxu0 %v3739_v58 }
  0x66   : > { %1226 = vmatmul.mubr.bf16.gmra.mxu1 %v3740_v59  ;;  %1072 = vmatprep.mubr.bf16.mxu0 %v3741_v60  ;;  %v3804_v60 = vld [vmem:[%s4761_s3 + $0x50] sm:$0xff]  }
  0x67   : > { %1233 = vmatprep.mubr.bf16.mxu1 %v3743_v61  ;;  %1814 = vmatpush2.bf16.msra.mxu0 %v3804_v60 }
  0x68   : > { %1815 = vmatprep.subr.bf16.mxu0 %v3917_v33 }
  0x6d   : > { %1073 = vmatmul.mubr.bf16.gmra.mxu0 %v3745_v62 }
  0x6e   : > { %1234 = vmatmul.mubr.bf16.gmra.mxu1 %v3746_v63  ;;  %1080 = vmatprep.mubr.bf16.mxu0 %v3747_v0 }
  0x6f   : > { %1241 = vmatprep.mubr.bf16.mxu1 %v3749_v1 }
  0x75   : > { %1081 = vmatmul.mubr.bf16.gmra.mxu0 %v3751_v2 }
  0x76   : > { %1242 = vmatmul.mubr.bf16.gmra.mxu1 %v3752_v3  ;;  %1088 = vmatprep.mubr.bf16.mxu0 %v3753_v4 }
  0x77   : > { %1249 = vmatprep.mubr.bf16.mxu1 %v3755_v5 }
  0x7d   : > { %1089 = vmatmul.mubr.bf16.gmra.mxu0 %v3757_v6 }
  0x7e   : > { %1250 = vmatmul.mubr.bf16.gmra.mxu1 %v3758_v7  ;;  %1096 = vmatprep.mubr.bf16.mxu0 %v3759_v8 }
  0x7f   : > { %1257 = vmatprep.mubr.bf16.mxu1 %v3761_v9  ;;  %v3805_v9 = vld [vmem:[%s4761_s3 + $0x48] sm:$0xff]  }
  0x80   : > { %1816 = vmatpush2.bf16.msra.mxu0 %v3805_v9 }
  0x81   : > { %1817 = vmatprep.subr.bf16.mxu0 %v3917_v33 }
  0x85   : > { %1097 = vmatmul.mubr.bf16.gmra.mxu0 %v3763_v10 }
  0x86   : > { %1258 = vmatmul.mubr.bf16.gmra.mxu1 %v3764_v11  ;;  %1104 = vmatprep.mubr.bf16.mxu0 %v3765_v12 }
  0x87   : > { %1265 = vmatprep.mubr.bf16.mxu1 %v3767_v13 }
  0x8d   : > { %1105 = vmatmul.mubr.bf16.gmra.mxu0 %v3769_v14 }
  0x8e   : > { %1266 = vmatmul.mubr.bf16.gmra.mxu1 %v3770_v15  ;;  %1112 = vmatprep.mubr.bf16.mxu0 %v3771_v16 }
  0x8f   : > { %1273 = vmatprep.mubr.bf16.mxu1 %v3773_v17 }
  0x95   : > { %1113 = vmatmul.mubr.bf16.gmra.mxu0 %v3775_v18  ;;  %v3806_v18 = vld [vmem:[%s4761_s3 + $0x40] sm:$0xff]  }
  0x96   : > { %1274 = vmatmul.mubr.bf16.gmra.mxu1 %v3776_v19  ;;  %1120 = vmatprep.mubr.bf16.mxu0 %v3777_v20 }
  0x97   : > { %1281 = vmatprep.mubr.bf16.mxu1 %v3779_v21  ;;  %1818 = vmatpush2.bf16.msra.mxu0 %v3806_v18 }
  0x98   : > { %2684 = vmatprep.subr.bf16.mxu0 %v3917_v33 }
  0x9d   : > { %1121 = vmatmul.mubr.bf16.gmra.mxu0 %v3781_v22 }
  0x9e   : > { %1282 = vmatmul.mubr.bf16.gmra.mxu1 %v3782_v23  ;;  %1128 = vmatprep.mubr.bf16.mxu0 %v3783_v24 }
  0x9f   : > { %1289 = vmatprep.mubr.bf16.mxu1 %v3785_v25 }
  0xa5   : > { %1129 = vmatmul.mubr.bf16.gmra.mxu0 %v3787_v26 }
  0xa6   : > { %1290 = vmatmul.mubr.bf16.gmra.mxu1 %v3788_v27  ;;  %1136 = vmatprep.mubr.bf16.mxu0 %v3789_v28 }
  0xa7   : > { %1297 = vmatprep.mubr.bf16.mxu1 %v3791_v29 }
  0xad   : > { %1137 = vmatmul.mubr.bf16.gmra.mxu0 %v3793_v30 }
  0xae   : > { %1298 = vmatmul.mubr.bf16.gmra.mxu1 %v3794_v31 }
  0xf5   : > { %v3295_v40 = vpop.f32.mrf.mxu0 }
  0xf6   : > { %v3407_v41 = vpop.f32.mrf.mxu1 }
  0xf7   : > { %v3296_v43 = vpop.f32.mrf.mxu0 }
  0xf8   : > { %v3297_v44 = vadd.f32 %v3296_v43, %v3295_v40  ;;  %v3408_v45 = vpop.f32.mrf.mxu1 }
  0xf9   : > { %v3298_v47 = vpop.f32.mrf.mxu0  ;;  %v3409_v49 = vadd.f32 %v3408_v45, %v3407_v41 }
  0xfa   : > { %v1019_v48 = vadd.f32 %v3297_v44, %v4218_v42  ;;  %v3410_v50 = vpop.f32.mrf.mxu1 }
  0xfb   : > { %v3299_v52 = vpop.f32.mrf.mxu0 }
  0xfc   : > { %v1180_v53 = vadd.f32 %v3409_v49, %v1019_v48  ;;  %v3300_v54 = vadd.f32 %v3299_v52, %v3298_v47  ;;  %v3411_v55 = vpop.f32.mrf.mxu1 }
  0xfd   : > { %v3301_v56 = vpop.f32.mrf.mxu0  ;;  %v3412_v58 = vadd.f32 %v3411_v55, %v3410_v50 }
  0xfe   : > { %1307 = vst.msk [vmem:[#allocation2] sm:$0xff] %vm1306_vm0, %v1180_v53  ;;  %v1022_v57 = vadd.f32 %v3300_v54, %v4218_v42  ;;  %v3413_v59 = vpop.f32.mrf.mxu1 }
  0xff   : > { %v3302_v61 = vpop.f32.mrf.mxu0 }
 0x100   : > { %v1183_v62 = vadd.f32 %v3412_v58, %v1022_v57  ;;  %v3303_v63 = vadd.f32 %v3302_v61, %v3301_v56  ;;  %v3414_v0 = vpop.f32.mrf.mxu1 }
 0x101   : > { %v3304_v1 = vpop.f32.mrf.mxu0  ;;  %v3415_v3 = vadd.f32 %v3414_v0, %v3413_v59 }
 0x102   : > { %1308 = vst.msk [vmem:[#allocation2 + $0x8] sm:$0xff] %vm1306_vm0, %v1183_v62  ;;  %v1027_v2 = vadd.f32 %v3303_v63, %v4218_v42  ;;  %v3416_v4 = vpop.f32.mrf.mxu1 }
 0x103   : > { %v3305_v5 = vpop.f32.mrf.mxu0 }
 0x104   : > { %v1188_v6 = vadd.f32 %v3415_v3, %v1027_v2  ;;  %v3306_v7 = vadd.f32 %v3305_v5, %v3304_v1  ;;  %v3417_v8 = vpop.f32.mrf.mxu1 }
 0x105   : > { %v3307_v10 = vpop.f32.mrf.mxu0  ;;  %v3418_v12 = vadd.f32 %v3417_v8, %v3416_v4 }
 0x106   : > { %1309 = vst.msk [vmem:[#allocation2 + $0x10] sm:$0xff] %vm1306_vm0, %v1188_v6  ;;  %v1030_v11 = vadd.f32 %v3306_v7, %v4218_v42  ;;  %v3419_v13 = vpop.f32.mrf.mxu1 }
 0x107   : > { %v3308_v14 = vpop.f32.mrf.mxu0 }
 0x108   : > { %v1191_v15 = vadd.f32 %v3418_v12, %v1030_v11  ;;  %v3309_v16 = vadd.f32 %v3308_v14, %v3307_v10  ;;  %v3420_v17 = vpop.f32.mrf.mxu1 }
 0x109   : > { %v3310_v19 = vpop.f32.mrf.mxu0  ;;  %v3421_v21 = vadd.f32 %v3420_v17, %v3419_v13  ;;  %v4252_v36 = vld [vmem:[#allocation2 + $0x1] ss:$2 sm:$0xff]  ;;  %v1339_v39 = vld [vmem:[#allocation2] ss:$2 sm:$0xff] }
 0x10a   : > { %1310 = vst.msk [vmem:[#allocation2 + $0x18] sm:$0xff] %vm1306_vm0, %v1191_v15  ;;  %v1035_v20 = vadd.f32 %v3309_v16, %v4218_v42  ;;  %v3422_v22 = vpop.f32.mrf.mxu1 }
 0x10b   : > { %v3311_v23 = vpop.f32.mrf.mxu0 }
 0x10c   : > { %v1196_v24 = vadd.f32 %v3421_v21, %v1035_v20  ;;  %v3312_v25 = vadd.f32 %v3311_v23, %v3310_v19  ;;  %v3423_v26 = vpop.f32.mrf.mxu1 }
 0x10d   : > { %v3313_v27 = vpop.f32.mrf.mxu0  ;;  %v3424_v29 = vadd.f32 %v3423_v26, %v3422_v22 }
 0x10e   : > { %1311 = vst.msk [vmem:[#allocation2 + $0x20] sm:$0xff] %vm1306_vm0, %v1196_v24  ;;  %v1038_v28 = vadd.f32 %v3312_v25, %v4218_v42  ;;  %v3425_v30 = vpop.f32.mrf.mxu1 }
 0x10f   : > { %v3314_v31 = vpop.f32.mrf.mxu0 }
 0x110   : > { %v1199_v32 = vadd.f32 %v3424_v29, %v1038_v28  ;;  %v3315_v34 = vadd.f32 %v3314_v31, %v3313_v27  ;;  %v3426_v35 = vpop.f32.mrf.mxu1 }
 0x111   : > { %v3316_v37 = vpop.f32.mrf.mxu0  ;;  %v4254_v38 = vld [vmem:[#allocation2 + $0x11] ss:$2 sm:$0xff]  ;;  %v1341_v40 = vld [vmem:[#allocation2 + $0x10] ss:$2 sm:$0xff]  ;;  %v3427_v43 = vadd.f32 %v3426_v35, %v3425_v30 }
 0x112   : > { %1312 = vst.msk [vmem:[#allocation2 + $0x28] sm:$0xff] %vm1306_vm0, %v1199_v32  ;;  %v1043_v41 = vadd.f32 %v3315_v34, %v4218_v42  ;;  %v3428_v44 = vpop.f32.mrf.mxu1  ;;  %v1645_v45 = vpack.c.bf16 %v4254_v38, %v4252_v36  ;;  %v3592_v46 = vpack.i.bf16 %v1341_v40, %v1339_v39 }
 0x113   : > { %v3317_v47 = vpop.f32.mrf.mxu0 }
 0x114   : > { %v1204_v48 = vadd.f32 %v3427_v43, %v1043_v41  ;;  %v3318_v49 = vadd.f32 %v3317_v47, %v3316_v37  ;;  %v3429_v50 = vpop.f32.mrf.mxu1  ;;  %3130 = vmatprep.mubr.msk.bf16.mxu0 %vm1306_vm0, %v1645_v45  ;;  %3593 = vrot.lane.b32.xlu0 %v3592_v46, %s3918_s22 }
 0x115   : > { %v3319_v51 = vpop.f32.mrf.mxu0  ;;  %v3430_v53 = vadd.f32 %v3429_v50, %v3428_v44 }
 0x116   : > { %1313 = vst.msk [vmem:[#allocation2 + $0x30] sm:$0xff] %vm1306_vm0, %v1204_v48  ;;  %v1046_v52 = vadd.f32 %v3318_v49, %v4218_v42  ;;  %v3431_v54 = vpop.f32.mrf.mxu1 }
 0x117   : > { %v3320_v55 = vpop.f32.mrf.mxu0 }
 0x118   : > { %v1207_v56 = vadd.f32 %v3430_v53, %v1046_v52  ;;  %v3321_v57 = vadd.f32 %v3320_v55, %v3319_v51  ;;  %v3432_v58 = vpop.f32.mrf.mxu1 }
 0x119   : > { %v3322_v59 = vpop.f32.mrf.mxu0  ;;  %v3433_v61 = vadd.f32 %v3432_v58, %v3431_v54  ;;  %v1343_v12 = vld [vmem:[#allocation2 + $0x20] ss:$2 sm:$0xff] }
 0x11a   : > { %1314 = vst.msk [vmem:[#allocation2 + $0x38] sm:$0xff] %vm1306_vm0, %v1207_v56  ;;  %v1051_v60 = vadd.f32 %v3321_v57, %v4218_v42  ;;  %v3434_v62 = vpop.f32.mrf.mxu1 }
 0x11b   : > { %v3323_v63 = vpop.f32.mrf.mxu0 }
 0x11c   : > { %v1212_v0 = vadd.f32 %v3433_v61, %v1051_v60  ;;  %v3324_v1 = vadd.f32 %v3323_v63, %v3322_v59  ;;  %v3435_v2 = vpop.f32.mrf.mxu1 }
 0x11d   : > { %v3325_v3 = vpop.f32.mrf.mxu0  ;;  %v3436_v5 = vadd.f32 %v3435_v2, %v3434_v62 }
 0x11e   : > { %1315 = vst.msk [vmem:[#allocation2 + $0x40] sm:$0xff] %vm1306_vm0, %v1212_v0  ;;  %v1054_v4 = vadd.f32 %v3324_v1, %v4218_v42  ;;  %v3437_v6 = vpop.f32.mrf.mxu1 }
 0x11f   : > { %v3326_v7 = vpop.f32.mrf.mxu0 }
 0x120   : > { %v1215_v8 = vadd.f32 %v3436_v5, %v1054_v4  ;;  %v3327_v9 = vadd.f32 %v3326_v7, %v3325_v3  ;;  %v3438_v10 = vpop.f32.mrf.mxu1 }
 0x121   : > { %v3328_v11 = vpop.f32.mrf.mxu0  ;;  %v1345_v13 = vld [vmem:[#allocation2 + $0x30] ss:$2 sm:$0xff]  ;;  %v3439_v15 = vadd.f32 %v3438_v10, %v3437_v6 }
 0x122   : > { %1316 = vst.msk [vmem:[#allocation2 + $0x48] sm:$0xff] %vm1306_vm0, %v1215_v8  ;;  %v1059_v14 = vadd.f32 %v3327_v9, %v4218_v42  ;;  %v3440_v16 = vpop.f32.mrf.mxu1  ;;  %v3597_v17 = vpack.i.bf16 %v1345_v13, %v1343_v12 }
 0x123   : > { %v3329_v18 = vpop.f32.mrf.mxu0 }
 0x124   : > { %v1220_v19 = vadd.f32 %v3439_v15, %v1059_v14  ;;  %v3330_v20 = vadd.f32 %v3329_v18, %v3328_v11  ;;  %v3441_v21 = vpop.f32.mrf.mxu1  ;;  %3598 = vrot.lane.b32.xlu0 %v3597_v17, %s3918_s22 }
 0x125   : > { %v3331_v22 = vpop.f32.mrf.mxu0  ;;  %v3442_v24 = vadd.f32 %v3441_v21, %v3440_v16 }
 0x126   : > { %1317 = vst.msk [vmem:[#allocation2 + $0x50] sm:$0xff] %vm1306_vm0, %v1220_v19  ;;  %v1062_v23 = vadd.f32 %v3330_v20, %v4218_v42  ;;  %v3443_v25 = vpop.f32.mrf.mxu1 }
 0x127   : > { %v3332_v26 = vpop.f32.mrf.mxu0 }
 0x128   : > { %v1223_v27 = vadd.f32 %v3442_v24, %v1062_v23  ;;  %v3333_v28 = vadd.f32 %v3332_v26, %v3331_v22  ;;  %v3444_v29 = vpop.f32.mrf.mxu1 }
 0x129   : > { %v3334_v30 = vpop.f32.mrf.mxu0  ;;  %v3445_v32 = vadd.f32 %v3444_v29, %v3443_v25  ;;  %v1347_v51 = vld [vmem:[#allocation2 + $0x40] ss:$2 sm:$0xff] }
 0x12a   : > { %1318 = vst.msk [vmem:[#allocation2 + $0x58] sm:$0xff] %vm1306_vm0, %v1223_v27  ;;  %v1067_v31 = vadd.f32 %v3333_v28, %v4218_v42  ;;  %v3446_v34 = vpop.f32.mrf.mxu1 }
 0x12b   : > { %v3335_v35 = vpop.f32.mrf.mxu0 }
 0x12c   : > { %v1228_v37 = vadd.f32 %v3445_v32, %v1067_v31  ;;  %v3336_v39 = vadd.f32 %v3335_v35, %v3334_v30  ;;  %v3447_v40 = vpop.f32.mrf.mxu1 }
 0x12d   : > { %v3337_v41 = vpop.f32.mrf.mxu0  ;;  %v3448_v44 = vadd.f32 %v3447_v40, %v3446_v34 }
 0x12e   : > { %1319 = vst.msk [vmem:[#allocation2 + $0x60] sm:$0xff] %vm1306_vm0, %v1228_v37  ;;  %v1070_v43 = vadd.f32 %v3336_v39, %v4218_v42  ;;  %v3449_v45 = vpop.f32.mrf.mxu1 }
 0x12f   : > { %v3338_v46 = vpop.f32.mrf.mxu0 }
 0x130   : > { %v1231_v47 = vadd.f32 %v3448_v44, %v1070_v43  ;;  %v3339_v48 = vadd.f32 %v3338_v46, %v3337_v41  ;;  %v3450_v49 = vpop.f32.mrf.mxu1 }
 0x131   : > { %v3340_v50 = vpop.f32.mrf.mxu0  ;;  %v1349_v52 = vld [vmem:[#allocation2 + $0x50] ss:$2 sm:$0xff]  ;;  %v3451_v54 = vadd.f32 %v3450_v49, %v3449_v45 }
 0x132   : > { %1320 = vst.msk [vmem:[#allocation2 + $0x68] sm:$0xff] %vm1306_vm0, %v1231_v47  ;;  %v1075_v53 = vadd.f32 %v3339_v48, %v4218_v42  ;;  %v3452_v55 = vpop.f32.mrf.mxu1  ;;  %v3602_v56 = vpack.i.bf16 %v1349_v52, %v1347_v51 }
 0x133   : > { %v3341_v57 = vpop.f32.mrf.mxu0 }
 0x134   : > { %v1236_v58 = vadd.f32 %v3451_v54, %v1075_v53  ;;  %v3342_v59 = vadd.f32 %v3341_v57, %v3340_v50  ;;  %v3453_v60 = vpop.f32.mrf.mxu1  ;;  %3603 = vrot.lane.b32.xlu1 %v3602_v56, %s3918_s22 }
 0x135   : > { %v3343_v61 = vpop.f32.mrf.mxu0  ;;  %v3454_v63 = vadd.f32 %v3453_v60, %v3452_v55 }
 0x136   : > { %1321 = vst.msk [vmem:[#allocation2 + $0x70] sm:$0xff] %vm1306_vm0, %v1236_v58  ;;  %v1078_v62 = vadd.f32 %v3342_v59, %v4218_v42  ;;  %v3455_v0 = vpop.f32.mrf.mxu1 }
 0x137   : > { %v3344_v1 = vpop.f32.mrf.mxu0 }
 0x138   : > { %v1239_v2 = vadd.f32 %v3454_v63, %v1078_v62  ;;  %v3345_v3 = vadd.f32 %v3344_v1, %v3343_v61  ;;  %v3456_v4 = vpop.f32.mrf.mxu1 }
 0x139   : > { %v3346_v5 = vpop.f32.mrf.mxu0  ;;  %v3457_v7 = vadd.f32 %v3456_v4, %v3455_v0  ;;  %v1351_v22 = vld [vmem:[#allocation2 + $0x60] ss:$2 sm:$0xff] }
 0x13a   : > { %1322 = vst.msk [vmem:[#allocation2 + $0x78] sm:$0xff] %vm1306_vm0, %v1239_v2  ;;  %v1083_v6 = vadd.f32 %v3345_v3, %v4218_v42  ;;  %v3458_v8 = vpop.f32.mrf.mxu1 }
 0x13b   : > { %v3347_v9 = vpop.f32.mrf.mxu0 }
 0x13c   : > { %v1244_v10 = vadd.f32 %v3457_v7, %v1083_v6  ;;  %v3348_v11 = vadd.f32 %v3347_v9, %v3346_v5  ;;  %v3459_v12 = vpop.f32.mrf.mxu1 }
 0x13d   : > { %v3349_v13 = vpop.f32.mrf.mxu0  ;;  %v3460_v15 = vadd.f32 %v3459_v12, %v3458_v8 }
 0x13e   : > { %1323 = vst.msk [vmem:[#allocation2 + $0x80] sm:$0xff] %vm1306_vm0, %v1244_v10  ;;  %v1086_v14 = vadd.f32 %v3348_v11, %v4218_v42  ;;  %v3461_v16 = vpop.f32.mrf.mxu1 }
 0x13f   : > { %v3350_v17 = vpop.f32.mrf.mxu0 }
 0x140   : > { %v1247_v18 = vadd.f32 %v3460_v15, %v1086_v14  ;;  %v3351_v19 = vadd.f32 %v3350_v17, %v3349_v13  ;;  %v3462_v20 = vpop.f32.mrf.mxu1 }
 0x141   : > { %v3352_v21 = vpop.f32.mrf.mxu0  ;;  %v1353_v23 = vld [vmem:[#allocation2 + $0x70] ss:$2 sm:$0xff]  ;;  %v3463_v25 = vadd.f32 %v3462_v20, %v3461_v16 }
 0x142   : > { %1324 = vst.msk [vmem:[#allocation2 + $0x88] sm:$0xff] %vm1306_vm0, %v1247_v18  ;;  %v1091_v24 = vadd.f32 %v3351_v19, %v4218_v42  ;;  %v3464_v26 = vpop.f32.mrf.mxu1  ;;  %v3607_v27 = vpack.i.bf16 %v1353_v23, %v1351_v22 }
 0x143   : > { %v3353_v28 = vpop.f32.mrf.mxu0 }
 0x144   : > { %v1252_v29 = vadd.f32 %v3463_v25, %v1091_v24  ;;  %v3354_v30 = vadd.f32 %v3353_v28, %v3352_v21  ;;  %v3465_v31 = vpop.f32.mrf.mxu1  ;;  %3608 = vrot.lane.b32.xlu1 %v3607_v27, %s3918_s22 }
 0x145   : > { %v3355_v32 = vpop.f32.mrf.mxu0  ;;  %v3466_v35 = vadd.f32 %v3465_v31, %v3464_v26 }
 0x146   : > { %1325 = vst.msk [vmem:[#allocation2 + $0x90] sm:$0xff] %vm1306_vm0, %v1252_v29  ;;  %v1094_v34 = vadd.f32 %v3354_v30, %v4218_v42  ;;  %v3467_v37 = vpop.f32.mrf.mxu1 }
 0x147   : > { %v3356_v39 = vpop.f32.mrf.mxu0 }
 0x148   : > { %v1255_v40 = vadd.f32 %v3466_v35, %v1094_v34  ;;  %v3357_v41 = vadd.f32 %v3356_v39, %v3355_v32  ;;  %v3468_v43 = vpop.f32.mrf.mxu1 }
 0x149   : > { %v3358_v44 = vpop.f32.mrf.mxu0  ;;  %v3469_v46 = vadd.f32 %v3468_v43, %v3467_v37  ;;  %v1355_v61 = vld [vmem:[#allocation2 + $0x80] ss:$2 sm:$0xff] }
 0x14a   : > { %1326 = vst.msk [vmem:[#allocation2 + $0x98] sm:$0xff] %vm1306_vm0, %v1255_v40  ;;  %v1099_v45 = vadd.f32 %v3357_v41, %v4218_v42  ;;  %v3470_v47 = vpop.f32.mrf.mxu1 }
 0x14b   : > { %v3359_v48 = vpop.f32.mrf.mxu0 }
 0x14c   : > { %v1260_v49 = vadd.f32 %v3469_v46, %v1099_v45  ;;  %v3360_v50 = vadd.f32 %v3359_v48, %v3358_v44  ;;  %v3471_v51 = vpop.f32.mrf.mxu1 }
 0x14d   : > { %v3361_v52 = vpop.f32.mrf.mxu0  ;;  %v3472_v54 = vadd.f32 %v3471_v51, %v3470_v47 }
 0x14e   : > { %1327 = vst.msk [vmem:[#allocation2 + $0xa0] sm:$0xff] %vm1306_vm0, %v1260_v49  ;;  %v1102_v53 = vadd.f32 %v3360_v50, %v4218_v42  ;;  %v3473_v55 = vpop.f32.mrf.mxu1 }
 0x14f   : > { %v3362_v56 = vpop.f32.mrf.mxu0 }
 0x150   : > { %v1263_v57 = vadd.f32 %v3472_v54, %v1102_v53  ;;  %v3363_v58 = vadd.f32 %v3362_v56, %v3361_v52  ;;  %v3474_v59 = vpop.f32.mrf.mxu1 }
 0x151   : > { %v3364_v60 = vpop.f32.mrf.mxu0  ;;  %v1357_v62 = vld [vmem:[#allocation2 + $0x90] ss:$2 sm:$0xff]  ;;  %v3475_v0 = vadd.f32 %v3474_v59, %v3473_v55 }
 0x152   : > { %1328 = vst.msk [vmem:[#allocation2 + $0xa8] sm:$0xff] %vm1306_vm0, %v1263_v57  ;;  %v1107_v63 = vadd.f32 %v3363_v58, %v4218_v42  ;;  %v3476_v1 = vpop.f32.mrf.mxu1  ;;  %v3612_v2 = vpack.i.bf16 %v1357_v62, %v1355_v61 }
 0x153   : > { %v3365_v3 = vpop.f32.mrf.mxu0 }
 0x154   : > { %v1268_v4 = vadd.f32 %v3475_v0, %v1107_v63  ;;  %v3366_v5 = vadd.f32 %v3365_v3, %v3364_v60  ;;  %v3477_v6 = vpop.f32.mrf.mxu1  ;;  %3613 = vrot.lane.b32.xlu0 %v3612_v2, %s3918_s22 }
 0x155   : > { %v3367_v7 = vpop.f32.mrf.mxu0  ;;  %v3478_v9 = vadd.f32 %v3477_v6, %v3476_v1 }
 0x156   : > { %1329 = vst.msk [vmem:[#allocation2 + $0xb0] sm:$0xff] %vm1306_vm0, %v1268_v4  ;;  %v1110_v8 = vadd.f32 %v3366_v5, %v4218_v42  ;;  %v3479_v10 = vpop.f32.mrf.mxu1 }
 0x157   : > { %v3368_v11 = vpop.f32.mrf.mxu0 }
 0x158   : > { %v1271_v12 = vadd.f32 %v3478_v9, %v1110_v8  ;;  %v3369_v13 = vadd.f32 %v3368_v11, %v3367_v7  ;;  %v3480_v14 = vpop.f32.mrf.mxu1 }
 0x159   : > { %v3370_v15 = vpop.f32.mrf.mxu0  ;;  %v3481_v17 = vadd.f32 %v3480_v14, %v3479_v10  ;;  %v1359_v32 = vld [vmem:[#allocation2 + $0xa0] ss:$2 sm:$0xff] }
 0x15a   : > { %1330 = vst.msk [vmem:[#allocation2 + $0xb8] sm:$0xff] %vm1306_vm0, %v1271_v12  ;;  %v1115_v16 = vadd.f32 %v3369_v13, %v4218_v42  ;;  %v3482_v18 = vpop.f32.mrf.mxu1 }
 0x15b   : > { %v3371_v19 = vpop.f32.mrf.mxu0 }
 0x15c   : > { %v1276_v20 = vadd.f32 %v3481_v17, %v1115_v16  ;;  %v3372_v21 = vadd.f32 %v3371_v19, %v3370_v15  ;;  %v3483_v22 = vpop.f32.mrf.mxu1 }
 0x15d   : > { %v3373_v23 = vpop.f32.mrf.mxu0  ;;  %v3484_v25 = vadd.f32 %v3483_v22, %v3482_v18 }
 0x15e   : > { %1331 = vst.msk [vmem:[#allocation2 + $0xc0] sm:$0xff] %vm1306_vm0, %v1276_v20  ;;  %v1118_v24 = vadd.f32 %v3372_v21, %v4218_v42  ;;  %v3485_v26 = vpop.f32.mrf.mxu1  ;;  %v1467_v20 = vlaneseq }
 0x15f   : > { %v3374_v27 = vpop.f32.mrf.mxu0 }
 0x160   : > { %v1279_v28 = vadd.f32 %v3484_v25, %v1118_v24  ;;  %v3375_v29 = vadd.f32 %v3374_v27, %v3373_v23  ;;  %v3486_v30 = vpop.f32.mrf.mxu1  ;;  %v4319_v21 = vshrl.u32 %v1467_v20, 7  ;;  %v1419_v24 = vrot.slane %v4252_v36, 7 }
 0x161   : > { %v3376_v31 = vpop.f32.mrf.mxu0  ;;  %v1361_v34 = vld [vmem:[#allocation2 + $0xb0] ss:$2 sm:$0xff]  ;;  %v3487_v37 = vadd.f32 %v3486_v30, %v3485_v26  ;;  %v1420_v27 = vrot.slane %v4254_v38, 7 }
 0x162   : > { %1332 = vst.msk [vmem:[#allocation2 + $0xc8] sm:$0xff] %vm1306_vm0, %v1279_v28  ;;  %v1123_v35 = vadd.f32 %v3375_v29, %v4218_v42  ;;  %v3488_v39 = vpop.f32.mrf.mxu1  ;;  %v3617_v40 = vpack.i.bf16 %v1361_v34, %v1359_v32  ;;  %v1484_v25 = vand.u32 15, %v4319_v21  ;;  %v1377_v34 = vld [vmem:[#allocation2 + $0x31] ss:$2 sm:$0xff]  ;;  %v4331_v38 = vadd.s32 16, %v4319_v21 }
 0x163   : > { %v3377_v41 = vpop.f32.mrf.mxu0 }
 0x164   : > { %v1284_v43 = vadd.f32 %v3487_v37, %v1123_v35  ;;  %v3378_v44 = vadd.f32 %v3377_v41, %v3376_v31  ;;  %v3489_v45 = vpop.f32.mrf.mxu1  ;;  %3618 = vrot.lane.b32.xlu1 %v3617_v40, %s3918_s22  ;;  %vm1500_vm2 = vcmp.ne.s32.totalorder %v1484_v25, 0  ;;  %v1421_v31 = vsel %vm1418_vm1, %v1419_v24, %v1420_v27 }
 0x165   : > { %v3379_v46 = vpop.f32.mrf.mxu0  ;;  %v3490_v48 = vadd.f32 %v3489_v45, %v3488_v39  ;;  %v1375_v39 = vld [vmem:[#allocation2 + $0x21] ss:$2 sm:$0xff] }
 0x166   : > { %1333 = vst.msk [vmem:[#allocation2 + $0xd0] sm:$0xff] %vm1306_vm0, %v1284_v43  ;;  %v1126_v47 = vadd.f32 %v3378_v44, %v4218_v42  ;;  %v3491_v49 = vpop.f32.mrf.mxu1  ;;  %v1647_v40 = vpack.c.bf16 %v1377_v34, %v1375_v39  ;;  %v1422_v41 = vrot.slane %v1375_v39, 7  ;;  %v1486_v43 = vand.u32 15, %v4331_v38 }
 0x167   : > { %v3380_v50 = vpop.f32.mrf.mxu0  ;;  %v1424_v44 = vrot.slane %v1377_v34, 7 }
 0x168   : > { %v1287_v51 = vadd.f32 %v3490_v48, %v1126_v47  ;;  %v3381_v52 = vadd.f32 %v3380_v50, %v3379_v46  ;;  %v3492_v53 = vpop.f32.mrf.mxu1  ;;  %v1423_v45 = vsel %vm1418_vm1, %v1420_v27, %v1422_v41  ;;  %vm1502_vm3 = vcmp.ne.s32.totalorder %v1486_v43, 0 }
 0x169   : > { %v3382_v54 = vpop.f32.mrf.mxu0  ;;  %v3493_v56 = vadd.f32 %v3492_v53, %v3491_v49  ;;  %v1363_v7 = vld [vmem:[#allocation2 + $0xc0] ss:$2 sm:$0xff]  ;;  %v1425_v49 = vsel %vm1418_vm1, %v1422_v41, %v1424_v44  ;;  %v1550_v50 = vsel %vm1502_vm3, %v1423_v45, 0.0  ;;  %v1391_v41 = vld [vmem:[#allocation2 + $0xa1] ss:$2 sm:$0xff] }
 0x16a   : > { %1334 = vst.msk [vmem:[#allocation2 + $0xd8] sm:$0xff] %vm1306_vm0, %v1287_v51  ;;  %v1131_v55 = vadd.f32 %v3381_v52, %v4218_v42  ;;  %v3494_v57 = vpop.f32.mrf.mxu1  ;;  %v1381_v51 = vld [vmem:[#allocation2 + $0x51] ss:$2 sm:$0xff]  ;;  %v1438_v45 = vrot.slane %v1391_v41, 7 }
 0x16b   : > { %v3383_v58 = vpop.f32.mrf.mxu0 }
 0x16c   : > { %v1292_v59 = vadd.f32 %v3493_v56, %v1131_v55  ;;  %v3384_v60 = vadd.f32 %v3383_v58, %v3382_v54  ;;  %v3495_v61 = vpop.f32.mrf.mxu1  ;;  %v1379_v55 = vld [vmem:[#allocation2 + $0x41] ss:$2 sm:$0xff] }
 0x16d   : > { %v3385_v62 = vpop.f32.mrf.mxu0  ;;  %v3496_v0 = vadd.f32 %v3495_v61, %v3494_v57  ;;  %v1649_v56 = vpack.c.bf16 %v1381_v51, %v1379_v55  ;;  %v4340_v57 = vadd.s32 32, %v4319_v21  ;;  %v1426_v58 = vrot.slane %v1379_v55, 7 }
 0x16e   : > { %1335 = vst.msk [vmem:[#allocation2 + $0xe0] sm:$0xff] %vm1306_vm0, %v1292_v59  ;;  %v1134_v63 = vadd.f32 %v3384_v60, %v4218_v42  ;;  %v3497_v1 = vpop.f32.mrf.mxu1  ;;  %v1428_v60 = vrot.slane %v1381_v51, 7 }
 0x16f   : > { %v3386_v2 = vpop.f32.mrf.mxu0  ;;  %v1488_v59 = vand.u32 15, %v4340_v57  ;;  %v1427_v61 = vsel %vm1418_vm1, %v1424_v44, %v1426_v58  ;;  %v1478_v44 = vadd.s32 80, %v4319_v21 }
 0x170   : > { %v1295_v3 = vadd.f32 %v3496_v0, %v1134_v63  ;;  %v3387_v4 = vadd.f32 %v3386_v2, %v3385_v62  ;;  %v3498_v5 = vpop.f32.mrf.mxu1 }
 0x171   : > { %v3388_v6 = vpop.f32.mrf.mxu0  ;;  %v1365_v8 = vld [vmem:[#allocation2 + $0xd0] ss:$2 sm:$0xff]  ;;  %v3499_v10 = vadd.f32 %v3498_v5, %v3497_v1  ;;  %vm1504_vm4 = vcmp.ne.s32.totalorder %v1488_v59, 0  ;;  %v1429_v1 = vsel %vm1418_vm1, %v1426_v58, %v1428_v60  ;;  %v1395_v59 = vld [vmem:[#allocation2 + $0xc1] ss:$2 sm:$0xff] }
 0x172   : > { %1336 = vst.msk [vmem:[#allocation2 + $0xe8] sm:$0xff] %vm1306_vm0, %v1295_v3  ;;  %v1139_v9 = vadd.f32 %v3387_v4, %v4218_v42  ;;  %v3500_v11 = vpop.f32.mrf.mxu1  ;;  %v3622_v12 = vpack.i.bf16 %v1365_v8, %v1363_v7  ;;  %v1552_v2 = vsel %vm1504_vm4, %v1427_v61, 0.0  ;;  %v1385_v3 = vld [vmem:[#allocation2 + $0x71] ss:$2 sm:$0xff]  ;;  %v1383_v7 = vld [vmem:[#allocation2 + $0x61] ss:$2 sm:$0xff] }
 0x173   : > { %v3389_v13 = vpop.f32.mrf.mxu0  ;;  %v1651_v8 = vpack.c.bf16 %v1385_v3, %v1383_v7  ;;  %v1480_v61 = vadd.s32 96, %v4319_v21 }
 0x174   : > { %v1300_v14 = vadd.f32 %v3499_v10, %v1139_v9  ;;  %v3390_v15 = vadd.f32 %v3389_v13, %v3388_v6  ;;  %v3501_v16 = vpop.f32.mrf.mxu1  ;;  %3623 = vrot.lane.b32.xlu0 %v3622_v12, %s3918_s22  ;;  %v4349_v9 = vadd.s32 48, %v4319_v21  ;;  %v1430_v10 = vrot.slane %v1383_v7, 7 }
 0x175   : > { %v3502_v18 = vadd.f32 %v3501_v16, %v3500_v11  ;;  %v1432_v12 = vrot.slane %v1385_v3, 7 }
 0x176   : > { %1337 = vst.msk [vmem:[#allocation2 + $0xf0] sm:$0xff] %vm1306_vm0, %v1300_v14  ;;  %v1142_v17 = vadd.f32 %v3390_v15, %v4218_v42  ;;  %v1466_v42 = vsel %vm1418_vm1, 0.0, %v1419_v24  ;;  %v1490_v11 = vand.u32 15, %v4349_v9  ;;  %v1431_v13 = vsel %vm1418_vm1, %v1428_v60, %v1430_v10  ;;  %v1387_v24 = vld [vmem:[#allocation2 + $0x81] ss:$2 sm:$0xff] }
 0x177   : > { %v1548_v32 = vsel %vm1500_vm2, %v1466_v42, 0.0  ;;  %v1434_v27 = vrot.slane %v1387_v24, 7 }
 0x178   : > { %v1303_v19 = vadd.f32 %v3502_v18, %v1142_v17  ;;  %vm1506_vm5 = vcmp.ne.s32.totalorder %v1490_v11, 0  ;;  %v1433_v17 = vsel %vm1418_vm1, %v1430_v10, %v1432_v12 }
 0x179   : > { %v1367_v22 = vld [vmem:[#allocation2 + $0xe0] ss:$2 sm:$0xff]  ;;  %v1554_v18 = vsel %vm1506_vm5, %v1431_v13, 0.0 }
 0x17a   : > { %1338 = vst.msk [vmem:[#allocation2 + $0xf8] sm:$0xff] %vm1306_vm0, %v1303_v19  ;;  %v1389_v19 = vld [vmem:[#allocation2 + $0x91] ss:$2 sm:$0xff] }
 0x17b   : > { %v1653_v25 = vpack.c.bf16 %v1389_v19, %v1387_v24 }
 0x181   : > { %v1369_v23 = vld [vmem:[#allocation2 + $0xf0] ss:$2 sm:$0xff]  ;;  %v1401_v7 = vld [vmem:[#allocation2 + $0xf1] ss:$2 sm:$0xff] }
 0x182   : > { %v3627_v26 = vpack.i.bf16 %v1369_v23, %v1367_v22 }
 0x184   : > { %3628 = vrot.lane.b32.xlu1 %v3627_v26, %s3918_s22  ;;  %v1476_v26 = vadd.s32 64, %v4319_v21 }
 0x186   : > { %v3594_v28 = vpop.permute.xlu0 %3593  ;;  %v1492_v42 = vand.u32 15, %v1476_v26 }
 0x187   : > { %v3596_v29 = vunpack.i.h.bf16 %v3594_v28  ;;  %v3595_v30 = vunpack.i.l.bf16 %v3594_v28  ;;  %v1436_v28 = vrot.slane %v1389_v19, 7 }
 0x188   : > { %vm1508_vm6 = vcmp.ne.s32.totalorder %v1492_v42, 0  ;;  %v3807_v42 = vld [vmem:[%s4761_s3 + $0x98] sm:$0xff]  }
 0x189   : > { %v1629_v36 = vsel %vm1306_vm0, %v1421_v31, %v3596_v29  ;;  %v1628_v35 = vsel %vm1306_vm0, %v1548_v32, %v3595_v30  ;;  %v1435_v29 = vsel %vm1418_vm1, %v1432_v12, %v1434_v27  ;;  %v1437_v34 = vsel %vm1418_vm1, %v1434_v27, %v1436_v28  ;;  %v1399_v12 = vld [vmem:[#allocation2 + $0xe1] ss:$2 sm:$0xff]  ;;  %2202 = vmatpush1.bf16.msra.mxu1 %v3807_v42 }
 0x18a   : > { %v1644_v37 = vpack.c.bf16 %v1629_v36, %v1628_v35  ;;  %v1556_v36 = vsel %vm1508_vm6, %v1435_v29, 0.0  ;;  %v1393_v35 = vld [vmem:[#allocation2 + $0xb1] ss:$2 sm:$0xff]  ;;  %v1659_v13 = vpack.c.bf16 %v1401_v7, %v1399_v12  ;;  %2203 = vmatprep.subr.bf16.mxu1 %v3917_v33  ;;  %v3809_v29 = vld [vmem:[%s4761_s3 + $0x88] sm:$0xff]  }
 0x18b   : > { %v1655_v43 = vpack.c.bf16 %v1393_v35, %v1391_v41  ;;  %v3813_v41 = vld [vmem:[%s4761_s3 + $0x68] sm:$0xff]  }
 0x18c   : > { %1820 = vmatmul.mubr.bf16.vlgmr.msra.gmra.mxu0 %v1644_v37 }
 0x18d   : > { %3131 = vmatprep.mubr.msk.bf16.mxu0 %vm1306_vm0, %v1647_v40 }
 0x196   : > { %v3599_v46 = vpop.permute.xlu0 %3598 }
 0x197   : > { %v3601_v47 = vunpack.i.h.bf16 %v3599_v46  ;;  %v3600_v48 = vunpack.i.l.bf16 %v3599_v46  ;;  %v1494_v46 = vand.u32 15, %v1478_v44 }
 0x199   : > { %v1630_v52 = vsel %vm1306_vm0, %v1550_v50, %v3600_v48  ;;  %v1631_v53 = vsel %vm1306_vm0, %v1425_v49, %v3601_v47  ;;  %v1440_v47 = vrot.slane %v1393_v35, 7  ;;  %v1439_v48 = vsel %vm1418_vm1, %v1436_v28, %v1438_v45  ;;  %v3808_v28 = vld [vmem:[%s4761_s3 + $0x90] sm:$0xff]  }
 0x19a   : > { %v1646_v54 = vpack.c.bf16 %v1631_v53, %v1630_v52  ;;  %vm1510_vm7 = vcmp.ne.s32.totalorder %v1494_v46, 0  ;;  %2204 = vmatpush1.bf16.msra.mxu1 %v3808_v28  ;;  %v3814_v46 = vld [vmem:[%s4761_s3 + $0x60] sm:$0xff]  }
 0x19b   : > { %v1441_v52 = vsel %vm1418_vm1, %v1438_v45, %v1440_v47  ;;  %v1558_v53 = vsel %vm1510_vm7, %v1439_v48, 0.0  ;;  %2205 = vmatprep.subr.bf16.mxu1 %v3917_v33 }
 0x19c   : > { %1828 = vmatmul.mubr.bf16.gmra.mxu0 %v1646_v54  ;;  %v1397_v54 = vld [vmem:[#allocation2 + $0xd1] ss:$2 sm:$0xff] }
 0x19d   : > { %3132 = vmatprep.mubr.msk.bf16.mxu0 %vm1306_vm0, %v1649_v56  ;;  %v1657_v60 = vpack.c.bf16 %v1397_v54, %v1395_v59 }
 0x19e   : > { %2206 = vmatpush1.bf16.msra.mxu1 %v3809_v29 }
 0x19f   : > { %2207 = vmatprep.subr.bf16.mxu1 %v3917_v33 }
 0x1a6   : > { %v3604_v62 = vpop.permute.xlu1 %3603 }
 0x1a7   : > { %v3606_v63 = vunpack.i.h.bf16 %v3604_v62  ;;  %v3605_v0 = vunpack.i.l.bf16 %v3604_v62  ;;  %v1442_v62 = vrot.slane %v1395_v59, 7 }
 0x1a9   : > { %v1632_v4 = vsel %vm1306_vm0, %v1552_v2, %v3605_v0  ;;  %v1633_v5 = vsel %vm1306_vm0, %v1429_v1, %v3606_v63  ;;  %v1496_v63 = vand.u32 15, %v1480_v61  ;;  %v1444_v0 = vrot.slane %v1397_v54, 7  ;;  %v3817_v54 = vld [vmem:[%s4761_s3 + $0xa8] sm:$0xff]  }
 0x1aa   : > { %v1648_v6 = vpack.c.bf16 %v1633_v5, %v1632_v4  ;;  %v1443_v1 = vsel %vm1418_vm1, %v1440_v47, %v1442_v62 }
 0x1ab   : > { %vm1512_vm8 = vcmp.ne.s32.totalorder %v1496_v63, 0  ;;  %v1445_v5 = vsel %vm1418_vm1, %v1442_v62, %v1444_v0  ;;  %v3818_v62 = vld [vmem:[%s4761_s3 + $0xa0] sm:$0xff]  }
 0x1ac   : > { %1836 = vmatmul.mubr.bf16.gmra.mxu0 %v1648_v6  ;;  %v1560_v6 = vsel %vm1512_vm8, %v1443_v1, 0.0 }
 0x1ad   : > { %3133 = vmatprep.mubr.msk.bf16.mxu0 %vm1306_vm0, %v1651_v8 }
 0x1b6   : > { %v3609_v14 = vpop.permute.xlu1 %3608 }
 0x1b7   : > { %v3611_v15 = vunpack.i.h.bf16 %v3609_v14  ;;  %v3610_v16 = vunpack.i.l.bf16 %v3609_v14  ;;  %v1482_v14 = vadd.s32 112, %v4319_v21 }
 0x1b9   : > { %v1634_v20 = vsel %vm1306_vm0, %v1554_v18, %v3610_v16  ;;  %v1635_v22 = vsel %vm1306_vm0, %v1433_v17, %v3611_v15  ;;  %v1446_v15 = vrot.slane %v1399_v12, 7  ;;  %v1498_v16 = vand.u32 15, %v1482_v14 }
 0x1ba   : > { %v1650_v23 = vpack.c.bf16 %v1635_v22, %v1634_v20  ;;  %v1448_v17 = vrot.slane %v1401_v7, 7 }
 0x1bb   : > { %v1447_v18 = vsel %vm1418_vm1, %v1444_v0, %v1446_v15  ;;  %vm1514_vm9 = vcmp.ne.s32.totalorder %v1498_v16, 0 }
 0x1bc   : > { %1844 = vmatmul.mubr.bf16.gmra.mxu0 %v1650_v23  ;;  %v1449_v23 = vsel %vm1418_vm1, %v1446_v15, %v1448_v17  ;;  %v1562_v24 = vsel %vm1514_vm9, %v1447_v18, 0.0 }
 0x1bd   : > { %3134 = vmatprep.mubr.msk.bf16.mxu0 %vm1306_vm0, %v1653_v25 }
 0x1c6   : > { %v3614_v30 = vpop.permute.xlu0 %3613 }
 0x1c7   : > { %v3616_v31 = vunpack.i.h.bf16 %v3614_v30  ;;  %v3615_v32 = vunpack.i.l.bf16 %v3614_v30  ;;  %v3810_v30 = vld [vmem:[%s4761_s3 + $0x80] sm:$0xff]  }
 0x1c8   : > { %2208 = vmatpush1.bf16.msra.mxu1 %v3810_v30 }
 0x1c9   : > { %v1636_v37 = vsel %vm1306_vm0, %v1556_v36, %v3615_v32  ;;  %v1637_v39 = vsel %vm1306_vm0, %v1437_v34, %v3616_v31  ;;  %v3811_v31 = vld [vmem:[%s4761_s3 + $0x78] sm:$0xff]   ;;  %2209 = vmatprep.subr.bf16.mxu1 %v3917_v33  ;;  %v4402_v32 = vld [vmem:[%s4762_s4] ss:$0 sm:$0xff]  ;;  %v3812_v34 = vld [vmem:[%s4761_s3 + $0x70] sm:$0xff]  }
 0x1ca   : > { %v1652_v40 = vpack.c.bf16 %v1637_v39, %v1636_v37 }
 0x1cc   : > { %1852 = vmatmul.mubr.bf16.gmra.mxu0 %v1652_v40  ;;  %2210 = vmatpush1.bf16.msra.mxu1 %v3811_v31 }
 0x1cd   : > { %3135 = vmatprep.mubr.msk.bf16.mxu0 %vm1306_vm0, %v1655_v43  ;;  %2211 = vmatprep.subr.bf16.mxu1 %v3917_v33 }
 0x1d0   : > { %2212 = vmatpush1.bf16.msra.mxu1 %v3812_v34 }
 0x1d1   : > { %2213 = vmatprep.subr.bf16.mxu1 %v3917_v33 }
 0x1d4   : > { %2214 = vmatpush1.bf16.msra.mxu1 %v3813_v41 }
 0x1d5   : > { %2215 = vmatprep.subr.bf16.mxu1 %v3917_v33 }
 0x1d6   : > { %v3619_v49 = vpop.permute.xlu1 %3618 }
 0x1d7   : > { %v3621_v50 = vunpack.i.h.bf16 %v3619_v49  ;;  %v3620_v51 = vunpack.i.l.bf16 %v3619_v49  ;;  %v3815_v49 = vld [vmem:[%s4761_s3 + $0xb8] sm:$0xff]  }
 0x1d8   : > { %2216 = vmatpush1.bf16.msra.mxu1 %v3814_v46 }
 0x1d9   : > { %v1638_v55 = vsel %vm1306_vm0, %v1558_v53, %v3620_v51  ;;  %v1639_v56 = vsel %vm1306_vm0, %v1441_v52, %v3621_v50  ;;  %2225 = vmatprep.subr.bf16.mxu1 %v3917_v33  ;;  %v3816_v50 = vld [vmem:[%s4761_s3 + $0xb0] sm:$0xff]  }
 0x1da   : > { %v1654_v58 = vpack.c.bf16 %v1639_v56, %v1638_v55 }
 0x1dc   : > { %1860 = vmatmul.mubr.bf16.gmra.mxu0 %v1654_v58  ;;  %2226 = vmatpush2.bf16.msra.mxu1 %v3815_v49 }
 0x1dd   : > { %3136 = vmatprep.mubr.msk.bf16.mxu0 %vm1306_vm0, %v1657_v60  ;;  %2227 = vmatprep.subr.bf16.mxu1 %v3917_v33 }
 0x1e0   : > { %2228 = vmatpush2.bf16.msra.mxu1 %v3816_v50 }
 0x1e1   : > { %2229 = vmatprep.subr.bf16.mxu1 %v3917_v33 }
 0x1e4   : > { %2230 = vmatpush2.bf16.msra.mxu1 %v3817_v54 }
 0x1e5   : > { %2231 = vmatprep.subr.bf16.mxu1 %v3917_v33 }
 0x1e6   : > { %v3624_v2 = vpop.permute.xlu0 %3623 }
 0x1e7   : > { %v3626_v3 = vunpack.i.h.bf16 %v3624_v2  ;;  %v3625_v4 = vunpack.i.l.bf16 %v3624_v2 }
 0x1e8   : > { %2232 = vmatpush2.bf16.msra.mxu1 %v3818_v62 }
 0x1e9   : > { %v1640_v8 = vsel %vm1306_vm0, %v1560_v6, %v3625_v4  ;;  %v1641_v10 = vsel %vm1306_vm0, %v1445_v5, %v3626_v3  ;;  %2477 = vmatprep.subr.bf16.mxu1 %v3917_v33 }
 0x1ea   : > { %v1656_v11 = vpack.c.bf16 %v1641_v10, %v1640_v8 }
 0x1ec   : > { %1868 = vmatmul.mubr.bf16.gmra.mxu0 %v1656_v11 }
 0x1ed   : > { %3137 = vmatprep.mubr.msk.bf16.mxu0 %vm1306_vm0, %v1659_v13 }
 0x1f6   : > { %v3629_v19 = vpop.permute.xlu1 %3628 }
 0x1f7   : > { %v3631_v20 = vunpack.i.h.bf16 %v3629_v19  ;;  %v3630_v22 = vunpack.i.l.bf16 %v3629_v19 }
 0x1f9   : > { %v1642_v25 = vsel %vm1306_vm0, %v1562_v24, %v3630_v22  ;;  %v1643_v26 = vsel %vm1306_vm0, %v1449_v23, %v3631_v20 }
 0x1fa   : > { %v1658_v27 = vpack.c.bf16 %v1643_v26, %v1642_v25 }
 0x1fc   : > { %1876 = vmatmul.mubr.bf16.gmra.mxu0 %v1658_v27 }
 0x24c   : > { %v1821_v36 = vpop.f32.mrf.mxu0 }
 0x24d   : > { %v1822_v35 = vadd.f32 %v4402_v32, %v1821_v36 }
 0x24e   : > { %v1823_v37 = vpop.f32.mrf.mxu0 }
 0x24f   : > { %vm1884_vm10 = vcmp.ge.f32.partialorder %v1822_v35, 0.0  ;;  %v1900_v39 = vmul.f32 0.2, %v1822_v35 }
 0x250   : > { %v1824_v40 = vpop.f32.mrf.mxu0 }
 0x251   : > { %v1916_v43 = vsel %vm1884_vm10, %v1822_v35, %v1900_v39  ;;  %v1825_v44 = vadd.f32 %v4402_v32, %v1824_v40 }
 0x252   : > { %1932 = vst.msk [vmem:[#allocation2] sm:$0xff] %vm1306_vm0, %v1916_v43  ;;  %v1826_v45 = vpop.f32.mrf.mxu0 }
 0x253   : > { %vm1885_vm11 = vcmp.ge.f32.partialorder %v1825_v44, 0.0  ;;  %v1901_v47 = vmul.f32 0.2, %v1825_v44 }
 0x255   : > { %v1917_v48 = vsel %vm1885_vm11, %v1825_v44, %v1901_v47 }
 0x256   : > { %1933 = vst.msk [vmem:[#allocation2 + $0x8] sm:$0xff] %vm1306_vm0, %v1917_v48 }
 0x25c   : > { %v1829_v51 = vpop.f32.mrf.mxu0 }
 0x25d   : > { %v1830_v52 = vadd.f32 %v4402_v32, %v1829_v51  ;;  %v4441_v1 = vld [vmem:[#allocation2 + $0x1] ss:$2 sm:$0xff]  ;;  %v1948_v4 = vld [vmem:[#allocation2] ss:$2 sm:$0xff] }
 0x25e   : > { %v1831_v53 = vpop.f32.mrf.mxu0 }
 0x25f   : > { %vm1886_vm12 = vcmp.ge.f32.partialorder %v1830_v52, 0.0  ;;  %v1902_v55 = vmul.f32 0.2, %v1830_v52 }
 0x260   : > { %v1832_v56 = vpop.f32.mrf.mxu0 }
 0x261   : > { %v1918_v58 = vsel %vm1886_vm12, %v1830_v52, %v1902_v55  ;;  %v1833_v59 = vadd.f32 %v4402_v32, %v1832_v56 }
 0x262   : > { %1934 = vst.msk [vmem:[#allocation2 + $0x10] sm:$0xff] %vm1306_vm0, %v1918_v58  ;;  %v1834_v60 = vpop.f32.mrf.mxu0 }
 0x263   : > { %vm1887_vm13 = vcmp.ge.f32.partialorder %v1833_v59, 0.0  ;;  %v1903_v61 = vmul.f32 0.2, %v1833_v59 }
 0x265   : > { %v1919_v63 = vsel %vm1887_vm13, %v1833_v59, %v1903_v61 }
 0x266   : > { %1935 = vst.msk [vmem:[#allocation2 + $0x18] sm:$0xff] %vm1306_vm0, %v1919_v63 }
 0x26c   : > { %v1837_v0 = vpop.f32.mrf.mxu0 }
 0x26d   : > { %v1838_v2 = vadd.f32 %v4402_v32, %v1837_v0  ;;  %v4444_v3 = vld [vmem:[#allocation2 + $0x11] ss:$2 sm:$0xff]  ;;  %v1949_v5 = vld [vmem:[#allocation2 + $0x10] ss:$2 sm:$0xff] }
 0x26e   : > { %v1839_v6 = vpop.f32.mrf.mxu0  ;;  %v2077_v7 = vpack.c.bf16 %v4444_v3, %v4441_v1  ;;  %v3632_v8 = vpack.i.bf16 %v1949_v5, %v1948_v4 }
 0x26f   : > { %vm1888_vm14 = vcmp.ge.f32.partialorder %v1838_v2, 0.0  ;;  %v1904_v10 = vmul.f32 0.2, %v1838_v2 }
 0x270   : > { %v1840_v11 = vpop.f32.mrf.mxu0  ;;  %3176 = vmatprep.mubr.msk.bf16.mxu1 %vm1306_vm0, %v2077_v7  ;;  %3633 = vrot.lane.b32.xlu0 %v3632_v8, %s3918_s22 }
 0x271   : > { %v1920_v12 = vsel %vm1888_vm14, %v1838_v2, %v1904_v10  ;;  %v1841_v13 = vadd.f32 %v4402_v32, %v1840_v11 }
 0x272   : > { %1936 = vst.msk [vmem:[#allocation2 + $0x20] sm:$0xff] %vm1306_vm0, %v1920_v12  ;;  %v1842_v14 = vpop.f32.mrf.mxu0 }
 0x273   : > { %vm1889_vm15 = vcmp.ge.f32.partialorder %v1841_v13, 0.0  ;;  %v1905_v15 = vmul.f32 0.2, %v1841_v13 }
 0x275   : > { %v1921_v16 = vsel %vm1889_vm15, %v1841_v13, %v1905_v15 }
 0x276   : > { %1937 = vst.msk [vmem:[#allocation2 + $0x28] sm:$0xff] %vm1306_vm0, %v1921_v16 }
 0x27c   : > { %v1845_v17 = vpop.f32.mrf.mxu0 }
 0x27d   : > { %v1846_v18 = vadd.f32 %v4402_v32, %v1845_v17  ;;  %v1950_v29 = vld [vmem:[#allocation2 + $0x20] ss:$2 sm:$0xff] }
 0x27e   : > { %v1847_v19 = vpop.f32.mrf.mxu0 }
 0x27f   : > { %vm1890_vm2 = vcmp.ge.f32.partialorder %v1846_v18, 0.0  ;;  %v1906_v20 = vmul.f32 0.2, %v1846_v18 }
 0x280   : > { %v1848_v22 = vpop.f32.mrf.mxu0 }
 0x281   : > { %v1922_v23 = vsel %vm1890_vm2, %v1846_v18, %v1906_v20  ;;  %v1849_v24 = vadd.f32 %v4402_v32, %v1848_v22  ;;  %v4477_v20 = vadd.s32 8, %v4319_v21  ;;  %v1972_v22 = vrot.slane %v4441_v1, 7 }
 0x282   : > { %1938 = vst.msk [vmem:[#allocation2 + $0x30] sm:$0xff] %vm1306_vm0, %v1922_v23  ;;  %v1850_v25 = vpop.f32.mrf.mxu0  ;;  %v1996_v23 = vand.u32 7, %v4319_v21 }
 0x283   : > { %vm1891_vm3 = vcmp.ge.f32.partialorder %v1849_v24, 0.0  ;;  %v1907_v26 = vmul.f32 0.2, %v1849_v24 }
 0x284   : > { %vm2004_vm12 = vcmp.ne.s32.totalorder %v1996_v23, 0 }
 0x285   : > { %v1923_v27 = vsel %vm1891_vm3, %v1849_v24, %v1907_v26  ;;  %v1997_v24 = vand.u32 7, %v4477_v20  ;;  %v1995_v26 = vsel %vm1418_vm1, 0.0, %v1972_v22 }
 0x286   : > { %1939 = vst.msk [vmem:[#allocation2 + $0x38] sm:$0xff] %vm1306_vm0, %v1923_v27 }
 0x287   : > { %vm2005_vm13 = vcmp.ne.s32.totalorder %v1997_v24, 0 }
 0x28c   : > { %v1853_v42 = vpop.f32.mrf.mxu0 }
 0x28d   : > { %v1854_v28 = vadd.f32 %v4402_v32, %v1853_v42  ;;  %v1951_v30 = vld [vmem:[#allocation2 + $0x30] ss:$2 sm:$0xff] }
 0x28e   : > { %v1855_v31 = vpop.f32.mrf.mxu0  ;;  %v3637_v34 = vpack.i.bf16 %v1951_v30, %v1950_v29  ;;  %v2028_v29 = vsel %vm2004_vm12, %v1995_v26, 0.0 }
 0x28f   : > { %vm1892_vm4 = vcmp.ge.f32.partialorder %v1854_v28, 0.0  ;;  %v1908_v36 = vmul.f32 0.2, %v1854_v28  ;;  %v1959_v31 = vld [vmem:[#allocation2 + $0x31] ss:$2 sm:$0xff] }
 0x290   : > { %v1856_v35 = vpop.f32.mrf.mxu0  ;;  %3638 = vrot.lane.b32.xlu1 %v3637_v34, %s3918_s22 }
 0x291   : > { %v1924_v37 = vsel %vm1892_vm4, %v1854_v28, %v1908_v36  ;;  %v1857_v39 = vadd.f32 %v4402_v32, %v1856_v35  ;;  %v1958_v36 = vld [vmem:[#allocation2 + $0x21] ss:$2 sm:$0xff] }
 0x292   : > { %1940 = vst.msk [vmem:[#allocation2 + $0x40] sm:$0xff] %vm1306_vm0, %v1924_v37  ;;  %v1858_v40 = vpop.f32.mrf.mxu0  ;;  %v2079_v35 = vpack.c.bf16 %v1959_v31, %v1958_v36  ;;  %v4489_v37 = vadd.s32 24, %v4319_v21 }
 0x293   : > { %vm1893_vm5 = vcmp.ge.f32.partialorder %v1857_v39, 0.0  ;;  %v1909_v41 = vmul.f32 0.2, %v1857_v39  ;;  %v1977_v40 = vrot.slane %v1959_v31, 7  ;;  %v4525_v31 = vld [vmem:[%s4762_s4 + $0x1] ss:$0 sm:$0xff] }
 0x295   : > { %v1925_v43 = vsel %vm1893_vm5, %v1857_v39, %v1909_v41  ;;  %v1975_v39 = vrot.slane %v1958_v36, 7  ;;  %v1998_v41 = vand.u32 7, %v4331_v38 }
 0x296   : > { %1941 = vst.msk [vmem:[#allocation2 + $0x48] sm:$0xff] %vm1306_vm0, %v1925_v43  ;;  %v1999_v43 = vand.u32 7, %v4489_v37 }
 0x297   : > { %vm2006_vm14 = vcmp.ne.s32.totalorder %v1998_v41, 0 }
 0x298   : > { %vm2007_vm15 = vcmp.ne.s32.totalorder %v1999_v43, 0 }
 0x29c   : > { %v1861_v44 = vpop.f32.mrf.mxu0 }
 0x29d   : > { %v1862_v45 = vadd.f32 %v4402_v32, %v1861_v44  ;;  %v1952_v56 = vld [vmem:[#allocation2 + $0x40] ss:$2 sm:$0xff] }
 0x29e   : > { %v1863_v46 = vpop.f32.mrf.mxu0 }
 0x29f   : > { %vm1894_vm6 = vcmp.ge.f32.partialorder %v1862_v45, 0.0  ;;  %v1910_v47 = vmul.f32 0.2, %v1862_v45 }
 0x2a0   : > { %v1864_v48 = vpop.f32.mrf.mxu0 }
 0x2a1   : > { %v1926_v49 = vsel %vm1894_vm6, %v1862_v45, %v1910_v47  ;;  %v1865_v50 = vadd.f32 %v4402_v32, %v1864_v48  ;;  %v1978_v45 = vsel %vm1418_vm1, %v1975_v39, %v1977_v40 }
 0x2a2   : > { %1942 = vst.msk [vmem:[#allocation2 + $0x50] sm:$0xff] %vm1306_vm0, %v1926_v49  ;;  %v1866_v51 = vpop.f32.mrf.mxu0 }
 0x2a3   : > { %vm1895_vm7 = vcmp.ge.f32.partialorder %v1865_v50, 0.0  ;;  %v1911_v52 = vmul.f32 0.2, %v1865_v50 }
 0x2a5   : > { %v1927_v53 = vsel %vm1895_vm7, %v1865_v50, %v1911_v52  ;;  %v2031_v50 = vsel %vm2007_vm15, %v1978_v45, 0.0  ;;  %v3824_v45 = vld [vmem:[%s4761_s3 + $0xd0] sm:$0xff]  }
 0x2a6   : > { %1943 = vst.msk [vmem:[#allocation2 + $0x58] sm:$0xff] %vm1306_vm0, %v1927_v53 }
 0x2ac   : > { %v1869_v54 = vpop.f32.mrf.mxu0 }
 0x2ad   : > { %v1870_v55 = vadd.f32 %v4402_v32, %v1869_v54  ;;  %v1953_v58 = vld [vmem:[#allocation2 + $0x50] ss:$2 sm:$0xff]  ;;  %v1961_v51 = vld [vmem:[#allocation2 + $0x51] ss:$2 sm:$0xff] }
 0x2ae   : > { %v1871_v59 = vpop.f32.mrf.mxu0  ;;  %v3642_v60 = vpack.i.bf16 %v1953_v58, %v1952_v56  ;;  %v1473_v58 = vadd.s32 40, %v4319_v21 }
 0x2af   : > { %vm1896_vm8 = vcmp.ge.f32.partialorder %v1870_v55, 0.0  ;;  %v1912_v61 = vmul.f32 0.2, %v1870_v55 }
 0x2b0   : > { %v1872_v62 = vpop.f32.mrf.mxu0  ;;  %3643 = vrot.lane.b32.xlu0 %v3642_v60, %s3918_s22  ;;  %v1981_v60 = vrot.slane %v1961_v51, 7 }
 0x2b1   : > { %v1928_v63 = vsel %vm1896_vm8, %v1870_v55, %v1912_v61  ;;  %v1873_v0 = vadd.f32 %v4402_v32, %v1872_v62  ;;  %v1960_v55 = vld [vmem:[#allocation2 + $0x41] ss:$2 sm:$0xff]  ;;  %v2000_v61 = vand.u32 7, %v4340_v57  ;;  %v2001_v62 = vand.u32 7, %v1473_v58 }
 0x2b2   : > { %1944 = vst.msk [vmem:[#allocation2 + $0x60] sm:$0xff] %vm1306_vm0, %v1928_v63  ;;  %v1874_v2 = vpop.f32.mrf.mxu0  ;;  %v2081_v56 = vpack.c.bf16 %v1961_v51, %v1960_v55  ;;  %v1979_v59 = vrot.slane %v1960_v55, 7  ;;  %v3828_v51 = vld [vmem:[%s4761_s3 + $0x110] sm:$0xff]  }
 0x2b3   : > { %vm1897_vm9 = vcmp.ge.f32.partialorder %v1873_v0, 0.0  ;;  %v1913_v4 = vmul.f32 0.2, %v1873_v0  ;;  %vm2008_vm2 = vcmp.ne.s32.totalorder %v2000_v61, 0  ;;  %vm2009_vm3 = vcmp.ne.s32.totalorder %v2001_v62, 0 }
 0x2b4   : > { %v1980_v63 = vsel %vm1418_vm1, %v1977_v40, %v1979_v59 }
 0x2b5   : > { %v1929_v5 = vsel %vm1897_vm9, %v1873_v0, %v1913_v4  ;;  %v1982_v0 = vsel %vm1418_vm1, %v1979_v59, %v1981_v60 }
 0x2b6   : > { %1945 = vst.msk [vmem:[#allocation2 + $0x68] sm:$0xff] %vm1306_vm0, %v1929_v5 }
 0x2bc   : > { %v1877_v6 = vpop.f32.mrf.mxu0 }
 0x2bd   : > { %v1878_v7 = vadd.f32 %v4402_v32, %v1877_v6  ;;  %v1954_v17 = vld [vmem:[#allocation2 + $0x60] ss:$2 sm:$0xff]  ;;  %v2032_v6 = vsel %vm2008_vm2, %v1980_v63, 0.0 }
 0x2be   : > { %v1879_v8 = vpop.f32.mrf.mxu0  ;;  %v3830_v63 = vld [vmem:[%s4761_s3 + $0x100] sm:$0xff]  }
 0x2bf   : > { %vm1898_vm10 = vcmp.ge.f32.partialorder %v1878_v7, 0.0  ;;  %v1914_v10 = vmul.f32 0.2, %v1878_v7 }
 0x2c0   : > { %v1880_v11 = vpop.f32.mrf.mxu0 }
 0x2c1   : > { %v1930_v12 = vsel %vm1898_vm10, %v1878_v7, %v1914_v10  ;;  %v1881_v13 = vadd.f32 %v4402_v32, %v1880_v11  ;;  %v1973_v32 = vrot.slane %v4444_v3, 7  ;;  %v2033_v7 = vsel %vm2009_vm3, %v1982_v0, 0.0 }
 0x2c2   : > { %1946 = vst.msk [vmem:[#allocation2 + $0x70] sm:$0xff] %vm1306_vm0, %v1930_v12  ;;  %v1882_v14 = vpop.f32.mrf.mxu0 }
 0x2c3   : > { %vm1899_vm11 = vcmp.ge.f32.partialorder %v1881_v13, 0.0  ;;  %v1915_v15 = vmul.f32 0.2, %v1881_v13  ;;  %v1974_v25 = vsel %vm1418_vm1, %v1972_v22, %v1973_v32  ;;  %v1976_v44 = vsel %vm1418_vm1, %v1973_v32, %v1975_v39 }
 0x2c4   : > { %v2029_v30 = vsel %vm2005_vm13, %v1974_v25, 0.0  ;;  %v2030_v49 = vsel %vm2006_vm14, %v1976_v44, 0.0  ;;  %v1475_v14 = vadd.s32 56, %v4319_v21 }
 0x2c5   : > { %v1931_v16 = vsel %vm1899_vm11, %v1881_v13, %v1915_v15  ;;  %v1962_v13 = vld [vmem:[#allocation2 + $0x61] ss:$2 sm:$0xff] }
 0x2c6   : > { %1947 = vst.msk [vmem:[#allocation2 + $0x78] sm:$0xff] %vm1306_vm0, %v1931_v16  ;;  %v1983_v15 = vrot.slane %v1962_v13, 7 }
 0x2cd   : > { %v1955_v18 = vld [vmem:[#allocation2 + $0x70] ss:$2 sm:$0xff]  ;;  %v1963_v8 = vld [vmem:[#allocation2 + $0x71] ss:$2 sm:$0xff] }
 0x2ce   : > { %v3647_v19 = vpack.i.bf16 %v1955_v18, %v1954_v17  ;;  %v2083_v57 = vpack.c.bf16 %v1963_v8, %v1962_v13  ;;  %v1985_v16 = vrot.slane %v1963_v8, 7  ;;  %v2002_v17 = vand.u32 7, %v4349_v9  ;;  %v3819_v9 = vld [vmem:[%s4761_s3 + $0xf8] sm:$0xff]  }
 0x2cf   : > { %v2003_v18 = vand.u32 7, %v1475_v14 }
 0x2d0   : > { %3648 = vrot.lane.b32.xlu1 %v3647_v19, %s3918_s22  ;;  %v1984_v19 = vsel %vm1418_vm1, %v1981_v60, %v1983_v15  ;;  %v1986_v22 = vsel %vm1418_vm1, %v1983_v15, %v1985_v16  ;;  %vm2010_vm4 = vcmp.ne.s32.totalorder %v2002_v17, 0 }
 0x2d1   : > { %vm2011_vm5 = vcmp.ne.s32.totalorder %v2003_v18, 0  ;;  %v2034_v25 = vsel %vm2010_vm4, %v1984_v19, 0.0 }
 0x2d2   : > { %v2035_v26 = vsel %vm2011_vm5, %v1986_v22, 0.0 }
 0x2e2   : > { %v3634_v27 = vpop.permute.xlu0 %3633 }
 0x2e3   : > { %v3636_v42 = vunpack.i.h.bf16 %v3634_v27  ;;  %v3635_v28 = vunpack.i.l.bf16 %v3634_v27 }
 0x2e5   : > { %v2069_v1 = vsel %vm1306_vm0, %v2029_v30, %v3636_v42  ;;  %v2068_v3 = vsel %vm1306_vm0, %v2028_v29, %v3635_v28  ;;  %v3820_v29 = vld [vmem:[%s4761_s3 + $0xf0] sm:$0xff]   ;;  %v3821_v30 = vld [vmem:[%s4761_s3 + $0xe8] sm:$0xff]  }
 0x2e6   : > { %v2076_v34 = vpack.c.bf16 %v2069_v1, %v2068_v3  ;;  %v3822_v1 = vld [vmem:[%s4761_s3 + $0xe0] sm:$0xff]  }
 0x2e8   : > { %2234 = vmatmul.mubr.bf16.vlgmr.msra.gmra.mxu1 %v2076_v34 }
 0x2e9   : > { %3177 = vmatprep.mubr.msk.bf16.mxu1 %vm1306_vm0, %v2079_v35  ;;  %2478 = vmatpush1.bf16.msra.mxu1 %v3819_v9  ;;  %v3823_v35 = vld [vmem:[%s4761_s3 + $0xd8] sm:$0xff]  }
 0x2ea   : > { %2479 = vmatprep.subr.bf16.mxu1 %v3917_v33 }
 0x2ed   : > { %2480 = vmatpush1.bf16.msra.mxu1 %v3820_v29 }
 0x2ee   : > { %2481 = vmatprep.subr.bf16.mxu1 %v3917_v33 }
 0x2f1   : > { %2482 = vmatpush1.bf16.msra.mxu1 %v3821_v30 }
 0x2f2   : > { %2483 = vmatprep.subr.bf16.mxu1 %v3917_v33 }
 0x2f5   : > { %2484 = vmatpush1.bf16.msra.mxu1 %v3822_v1 }
 0x2f6   : > { %2485 = vmatprep.subr.bf16.mxu1 %v3917_v33 }
 0x2f9   : > { %2486 = vmatpush1.bf16.msra.mxu1 %v3823_v35 }
 0x2fa   : > { %2487 = vmatprep.subr.bf16.mxu1 %v3917_v33 }
 0x2fd   : > { %2488 = vmatpush1.bf16.msra.mxu1 %v3824_v45 }
 0x2fe   : > { %2489 = vmatprep.subr.bf16.mxu1 %v3917_v33 }
 0x302   : > { %v3639_v46 = vpop.permute.xlu1 %3638 }
 0x303   : > { %v3641_v47 = vunpack.i.h.bf16 %v3639_v46  ;;  %v3640_v48 = vunpack.i.l.bf16 %v3639_v46 }
 0x305   : > { %v2070_v52 = vsel %vm1306_vm0, %v2030_v49, %v3640_v48  ;;  %v2071_v53 = vsel %vm1306_vm0, %v2031_v50, %v3641_v47  ;;  %v3825_v48 = vld [vmem:[%s4761_s3 + $0xc8] sm:$0xff]   ;;  %v3826_v49 = vld [vmem:[%s4761_s3 + $0xc0] sm:$0xff]   ;;  %v3827_v50 = vld [vmem:[%s4761_s3 + $0x118] sm:$0xff]  }
 0x306   : > { %v2078_v54 = vpack.c.bf16 %v2071_v53, %v2070_v52  ;;  %2490 = vmatpush1.bf16.msra.mxu1 %v3825_v48  ;;  %v3829_v52 = vld [vmem:[%s4761_s3 + $0x108] sm:$0xff]  }
 0x307   : > { %2491 = vmatprep.subr.bf16.mxu1 %v3917_v33 }
 0x308   : > { %2242 = vmatmul.mubr.bf16.gmra.mxu1 %v2078_v54 }
 0x309   : > { %3178 = vmatprep.mubr.msk.bf16.mxu1 %vm1306_vm0, %v2081_v56 }
 0x30a   : > { %2492 = vmatpush1.bf16.msra.mxu1 %v3826_v49 }
 0x30b   : > { %2501 = vmatprep.subr.bf16.mxu1 %v3917_v33 }
 0x30e   : > { %2502 = vmatpush2.bf16.msra.mxu1 %v3827_v50 }
 0x30f   : > { %2503 = vmatprep.subr.bf16.mxu1 %v3917_v33 }
 0x312   : > { %2504 = vmatpush2.bf16.msra.mxu1 %v3828_v51 }
 0x313   : > { %2505 = vmatprep.subr.bf16.mxu1 %v3917_v33 }
 0x316   : > { %2506 = vmatpush2.bf16.msra.mxu1 %v3829_v52 }
 0x317   : > { %2507 = vmatprep.subr.bf16.mxu1 %v3917_v33 }
 0x31a   : > { %2508 = vmatpush2.bf16.msra.mxu1 %v3830_v63 }
 0x322   : > { %v3644_v2 = vpop.permute.xlu0 %3643 }
 0x323   : > { %v3646_v4 = vunpack.i.h.bf16 %v3644_v2  ;;  %v3645_v5 = vunpack.i.l.bf16 %v3644_v2 }
 0x325   : > { %v2072_v10 = vsel %vm1306_vm0, %v2032_v6, %v3645_v5  ;;  %v2073_v11 = vsel %vm1306_vm0, %v2033_v7, %v3646_v4 }
 0x326   : > { %v2080_v12 = vpack.c.bf16 %v2073_v11, %v2072_v10 }
 0x328   : > { %2250 = vmatmul.mubr.bf16.gmra.mxu1 %v2080_v12 }
 0x329   : > { %3179 = vmatprep.mubr.msk.bf16.mxu1 %vm1306_vm0, %v2083_v57 }
 0x342   : > { %v3649_v32 = vpop.permute.xlu1 %3648 }
 0x343   : > { %v3651_v23 = vunpack.i.h.bf16 %v3649_v32  ;;  %v3650_v24 = vunpack.i.l.bf16 %v3649_v32 }
 0x345   : > { %v2074_v27 = vsel %vm1306_vm0, %v2034_v25, %v3650_v24  ;;  %v2075_v42 = vsel %vm1306_vm0, %v2035_v26, %v3651_v23 }
 0x346   : > { %v2082_v28 = vpack.c.bf16 %v2075_v42, %v2074_v27 }
 0x348   : > { %2258 = vmatmul.mubr.bf16.gmra.mxu1 %v2082_v28 }
 0x3a8   : > { %v2235_v3 = vpop.f32.mrf.mxu1 }
 0x3a9   : > { %v2236_v34 = vadd.f32 %v4525_v31, %v2235_v3 }
 0x3aa   : > { %v2237_v36 = vpop.f32.mrf.mxu1 }
 0x3ab   : > { %vm2266_vm6 = vcmp.ge.f32.partialorder %v2236_v34, 0.0  ;;  %v2274_v39 = vmul.f32 0.2, %v2236_v34 }
 0x3ac   : > { %v2238_v40 = vpop.f32.mrf.mxu1 }
 0x3ad   : > { %v2282_v41 = vsel %vm2266_vm6, %v2236_v34, %v2274_v39  ;;  %v2239_v43 = vadd.f32 %v4525_v31, %v2238_v40  ;;  %v2322_v34 = vand.u32 3, %v4319_v21 }
 0x3ae   : > { %2290 = vst.msk [vmem:[#allocation2] sm:$0xff] %vm1306_vm0, %v2282_v41  ;;  %v2240_v44 = vpop.f32.mrf.mxu1 }
 0x3af   : > { %vm2267_vm7 = vcmp.ge.f32.partialorder %v2239_v43, 0.0  ;;  %v2275_v46 = vmul.f32 0.2, %v2239_v43  ;;  %vm2326_vm14 = vcmp.ne.s32.totalorder %v2322_v34, 0 }
 0x3b1   : > { %v2283_v47 = vsel %vm2267_vm7, %v2239_v43, %v2275_v46 }
 0x3b2   : > { %2291 = vst.msk [vmem:[#allocation2 + $0x8] sm:$0xff] %vm1306_vm0, %v2283_v47 }
 0x3b9   : > { %v2302_v2 = vld [vmem:[#allocation2 + $0x1] ss:$2 sm:$0xff]  ;;  %v2298_v5 = vld [vmem:[#allocation2] ss:$2 sm:$0xff] }
 0x3ba   : > { %v2310_v1 = vrot.slane %v2302_v2, 7 }
 0x3bc   : > { %v2321_v35 = vsel %vm1418_vm1, 0.0, %v2310_v1 }
 0x3bd   : > { %v2338_v43 = vsel %vm2326_vm14, %v2321_v35, 0.0 }
 0x3c8   : > { %v2243_v53 = vpop.f32.mrf.mxu1 }
 0x3c9   : > { %v2244_v54 = vadd.f32 %v4525_v31, %v2243_v53  ;;  %v2324_v53 = vand.u32 3, %v4331_v38  ;;  %v3831_v38 = vld [vmem:[%s4761_s3 + $0x158] sm:$0xff]  }
 0x3ca   : > { %v2245_v55 = vpop.f32.mrf.mxu1  ;;  %2685 = vmatpush1.bf16.msra.mxu0 %v3831_v38 }
 0x3cb   : > { %vm2268_vm8 = vcmp.ge.f32.partialorder %v2244_v54, 0.0  ;;  %v2276_v56 = vmul.f32 0.2, %v2244_v54  ;;  %vm2328_vm2 = vcmp.ne.s32.totalorder %v2324_v53, 0  ;;  %2686 = vmatprep.subr.bf16.mxu0 %v3917_v33 }
 0x3cc   : > { %v2246_v58 = vpop.f32.mrf.mxu1 }
 0x3cd   : > { %v2284_v59 = vsel %vm2268_vm8, %v2244_v54, %v2276_v56  ;;  %v2247_v60 = vadd.f32 %v4525_v31, %v2246_v58  ;;  %v2325_v54 = vand.u32 3, %v4489_v37  ;;  %v3832_v37 = vld [vmem:[%s4761_s3 + $0x150] sm:$0xff]  }
 0x3ce   : > { %2292 = vst.msk [vmem:[#allocation2 + $0x10] sm:$0xff] %vm1306_vm0, %v2284_v59  ;;  %v2248_v61 = vpop.f32.mrf.mxu1  ;;  %2687 = vmatpush1.bf16.msra.mxu0 %v3832_v37 }
 0x3cf   : > { %vm2269_vm9 = vcmp.ge.f32.partialorder %v2247_v60, 0.0  ;;  %v2277_v62 = vmul.f32 0.2, %v2247_v60  ;;  %vm2329_vm3 = vcmp.ne.s32.totalorder %v2325_v54, 0  ;;  %2688 = vmatprep.subr.bf16.mxu0 %v3917_v33 }
 0x3d1   : > { %v2285_v0 = vsel %vm2269_vm9, %v2247_v60, %v2277_v62 }
 0x3d2   : > { %2293 = vst.msk [vmem:[#allocation2 + $0x18] sm:$0xff] %vm1306_vm0, %v2285_v0 }
 0x3d9   : > { %v4571_v4 = vld [vmem:[#allocation2 + $0x11] ss:$2 sm:$0xff]  ;;  %v2299_v6 = vld [vmem:[#allocation2 + $0x10] ss:$2 sm:$0xff] }
 0x3da   : > { %v2363_v7 = vpack.c.bf16 %v4571_v4, %v2302_v2  ;;  %v3652_v8 = vpack.i.bf16 %v2299_v6, %v2298_v5  ;;  %v2311_v3 = vrot.slane %v4571_v4, 7  ;;  %v3833_v4 = vld [vmem:[%s4761_s3 + $0x148] sm:$0xff]   ;;  %v3834_v5 = vld [vmem:[%s4761_s3 + $0x140] sm:$0xff]   ;;  %v3835_v6 = vld [vmem:[%s4761_s3 + $0x138] sm:$0xff]  }
 0x3db   : > { %2689 = vmatpush1.bf16.msra.mxu0 %v3833_v4 }
 0x3dc   : > { %3218 = vmatprep.mubr.msk.bf16.mxu1 %vm1306_vm0, %v2363_v7  ;;  %3653 = vrot.lane.b32.xlu0 %v3652_v8, %s3918_s22  ;;  %v2312_v36 = vsel %vm1418_vm1, %v2310_v1, %v2311_v3  ;;  %v3836_v7 = vld [vmem:[%s4761_s3 + $0x130] sm:$0xff]   ;;  %v3837_v8 = vld [vmem:[%s4761_s3 + $0x128] sm:$0xff]   ;;  %v3842_v1 = vld [vmem:[%s4761_s3 + $0x160] sm:$0xff]  }
 0x3dd   : > { %2690 = vmatprep.subr.bf16.mxu0 %v3917_v33 }
 0x3df   : > { %2691 = vmatpush1.bf16.msra.mxu0 %v3834_v5  ;;  %v3850_v5 = vld [vmem:[%s4763_s5] sm:$0xff]  }
 0x3e0   : > { %2692 = vmatprep.subr.bf16.mxu0 %v3917_v33 }
 0x3e3   : > { %2693 = vmatpush1.bf16.msra.mxu0 %v3835_v6 }
 0x3e4   : > { %2694 = vmatprep.subr.bf16.mxu0 %v3917_v33 }
 0x3e7   : > { %2695 = vmatpush1.bf16.msra.mxu0 %v3836_v7 }
 0x3e8   : > { %v2251_v10 = vpop.f32.mrf.mxu1  ;;  %2696 = vmatprep.subr.bf16.mxu0 %v3917_v33 }
 0x3e9   : > { %v2252_v11 = vadd.f32 %v4525_v31, %v2251_v10  ;;  %v3838_v10 = vld [vmem:[%s4761_s3 + $0x120] sm:$0xff]  }
 0x3ea   : > { %v2253_v12 = vpop.f32.mrf.mxu1 }
 0x3eb   : > { %vm2270_vm10 = vcmp.ge.f32.partialorder %v2252_v11, 0.0  ;;  %v2278_v13 = vmul.f32 0.2, %v2252_v11  ;;  %2697 = vmatpush1.bf16.msra.mxu0 %v3837_v8  ;;  %v3840_v12 = vld [vmem:[%s4761_s3 + $0x170] sm:$0xff]  }
 0x3ec   : > { %v2254_v57 = vpop.f32.mrf.mxu1  ;;  %2698 = vmatprep.subr.bf16.mxu0 %v3917_v33 }
 0x3ed   : > { %v2286_v14 = vsel %vm2270_vm10, %v2252_v11, %v2278_v13  ;;  %v2255_v15 = vadd.f32 %v4525_v31, %v2254_v57  ;;  %v3839_v11 = vld [vmem:[%s4761_s3 + $0x178] sm:$0xff]   ;;  %v3841_v13 = vld [vmem:[%s4761_s3 + $0x168] sm:$0xff]   ;;  %v3205_v57 = vld [vmem:[%s4762_s4 + $0x2] ss:$0 sm:$0xff] }
 0x3ee   : > { %2294 = vst.msk [vmem:[#allocation2 + $0x20] sm:$0xff] %vm1306_vm0, %v2286_v14  ;;  %v2256_v16 = vpop.f32.mrf.mxu1 }
 0x3ef   : > { %vm2271_vm11 = vcmp.ge.f32.partialorder %v2255_v15, 0.0  ;;  %v2279_v17 = vmul.f32 0.2, %v2255_v15  ;;  %2699 = vmatpush1.bf16.msra.mxu0 %v3838_v10 }
 0x3f0   : > { %2708 = vmatprep.subr.bf16.mxu0 %v3917_v33 }
 0x3f1   : > { %v2287_v18 = vsel %vm2271_vm11, %v2255_v15, %v2279_v17  ;;  %vm3920_vm11 = vmmov 0  }
 0x3f2   : > { %2295 = vst.msk [vmem:[#allocation2 + $0x28] sm:$0xff] %vm1306_vm0, %v2287_v18 }
 0x3f3   : > { %2709 = vmatpush2.bf16.msra.mxu0 %v3839_v11  ;;  %v3851_v11 = vld [vmem:[%s4765_s7 + $0x18] sm:$0xff]  }
 0x3f4   : > { %2710 = vmatprep.subr.bf16.mxu0 %v3917_v33 }
 0x3f7   : > { %2711 = vmatpush2.bf16.msra.mxu0 %v3840_v12 }
 0x3f8   : > { %2712 = vmatprep.subr.bf16.mxu0 %v3917_v33 }
 0x3f9   : > { %v2300_v9 = vld [vmem:[#allocation2 + $0x20] ss:$2 sm:$0xff]  ;;  %v2304_v49 = vld [vmem:[#allocation2 + $0x21] ss:$2 sm:$0xff] }
 0x3fa   : > { %v2313_v51 = vrot.slane %v2304_v49, 7 }
 0x3fb   : > { %2713 = vmatpush2.bf16.msra.mxu0 %v3841_v13  ;;  %v3852_v13 = vld [vmem:[%s4765_s7 + $0x10] sm:$0xff]  }
 0x3fc   : > { %v2314_v55 = vsel %vm1418_vm1, %v2311_v3, %v2313_v51  ;;  %2714 = vmatprep.subr.bf16.mxu0 %v3917_v33 }
 0x3fd   : > { %v2340_v61 = vsel %vm2328_vm2, %v2314_v55, 0.0 }
 0x3ff   : > { %2715 = vmatpush2.bf16.msra.mxu0 %v3842_v1 }
 0x408   : > { %v2259_v19 = vpop.f32.mrf.mxu1 }
 0x409   : > { %v2260_v22 = vadd.f32 %v4525_v31, %v2259_v19 }
 0x40a   : > { %v2261_v32 = vpop.f32.mrf.mxu1 }
 0x40b   : > { %vm2272_vm12 = vcmp.ge.f32.partialorder %v2260_v22, 0.0  ;;  %v2280_v23 = vmul.f32 0.2, %v2260_v22 }
 0x40c   : > { %v2262_v24 = vpop.f32.mrf.mxu1 }
 0x40d   : > { %v2288_v25 = vsel %vm2272_vm12, %v2260_v22, %v2280_v23  ;;  %v2263_v26 = vadd.f32 %v4525_v31, %v2262_v24  ;;  %v2323_v31 = vand.u32 3, %v4477_v20 }
 0x40e   : > { %2296 = vst.msk [vmem:[#allocation2 + $0x30] sm:$0xff] %vm1306_vm0, %v2288_v25  ;;  %v2264_v27 = vpop.f32.mrf.mxu1 }
 0x40f   : > { %vm2273_vm13 = vcmp.ge.f32.partialorder %v2263_v26, 0.0  ;;  %v2281_v42 = vmul.f32 0.2, %v2263_v26  ;;  %vm2327_vm15 = vcmp.ne.s32.totalorder %v2323_v31, 0 }
 0x410   : > { %v2339_v44 = vsel %vm2327_vm15, %v2312_v36, 0.0 }
 0x411   : > { %v2289_v28 = vsel %vm2273_vm13, %v2263_v26, %v2281_v42 }
 0x412   : > { %2297 = vst.msk [vmem:[#allocation2 + $0x38] sm:$0xff] %vm1306_vm0, %v2289_v28 }
 0x419   : > { %v2301_v29 = vld [vmem:[#allocation2 + $0x30] ss:$2 sm:$0xff]  ;;  %v2305_v45 = vld [vmem:[#allocation2 + $0x31] ss:$2 sm:$0xff] }
 0x41a   : > { %v3657_v30 = vpack.i.bf16 %v2301_v29, %v2300_v9  ;;  %v2365_v50 = vpack.c.bf16 %v2305_v45, %v2304_v49  ;;  %v2315_v52 = vrot.slane %v2305_v45, 7  ;;  %v2555_v45 = vand.u32 1, %v4477_v20 }
 0x41b   : > { %v3919_v20 = vmov 0.0  }
 0x41c   : > { %3658 = vrot.lane.b32.xlu1 %v3657_v30, %s3918_s22  ;;  %v2316_v56 = vsel %vm1418_vm1, %v2313_v51, %v2315_v52  ;;  %vm2557_vm9 = vcmp.ne.s32.totalorder %v2555_v45, 0  ;;  %3517 = vmatprep.subr.bf16.mxu1 %v3919_v20 }
 0x41d   : > { %v2341_v62 = vsel %vm2329_vm3, %v2316_v56, 0.0  ;;  %3537 = vmatprep.subr.bf16.mxu0 %v3919_v20  ;;  %v3844_v56 = vld [vmem:[%s4763_s5 + $0x30] sm:$0xff]  }
 0x44e   : > { %v3654_v39 = vpop.permute.xlu0 %3653 }
 0x44f   : > { %v3656_v40 = vunpack.i.h.bf16 %v3654_v39  ;;  %v3655_v41 = vunpack.i.l.bf16 %v3654_v39 }
 0x451   : > { %v2359_v46 = vsel %vm1306_vm0, %v2339_v44, %v3656_v40  ;;  %v2358_v47 = vsel %vm1306_vm0, %v2338_v43, %v3655_v41  ;;  %v2554_v44 = vand.u32 1, %v4319_v21  ;;  %v3843_v21 = vld [vmem:[%s4763_s5 + $0x38] sm:$0xff]  }
 0x452   : > { %v2362_v48 = vpack.c.bf16 %v2359_v46, %v2358_v47 }
 0x453   : > { %vm2556_vm8 = vcmp.ne.s32.totalorder %v2554_v44, 0 }
 0x454   : > { %2510 = vmatmul.mubr.bf16.vlgmr.msra.gmra.mxu1 %v2362_v48 }
 0x455   : > { %3219 = vmatprep.mubr.msk.bf16.mxu1 %vm1306_vm0, %v2365_v50  ;;  %3518 = vmatpush3.bf16.msra.mxu1 %v3843_v21 }
 0x456   : > { %3519 = vmatprep.subr.bf16.mxu1 %v3919_v20 }
 0x459   : > { %3520 = vmatpush3.bf16.msra.mxu1 %v3844_v56 }
 0x45a   : > { %3521 = vmatprep.subr.bf16.mxu1 %v3919_v20 }
 0x48e   : > { %v3659_v58 = vpop.permute.xlu1 %3658 }
 0x48f   : > { %v3661_v59 = vunpack.i.h.bf16 %v3659_v58  ;;  %v3660_v60 = vunpack.i.l.bf16 %v3659_v58  ;;  %v3845_v58 = vld [vmem:[%s4763_s5 + $0x28] sm:$0xff]  }
 0x490   : > { %3522 = vmatpush3.bf16.msra.mxu1 %v3845_v58 }
 0x491   : > { %v2360_v63 = vsel %vm1306_vm0, %v2340_v61, %v3660_v60  ;;  %v2361_v0 = vsel %vm1306_vm0, %v2341_v62, %v3661_v59  ;;  %v3846_v59 = vld [vmem:[%s4763_s5 + $0x20] sm:$0xff]   ;;  %3523 = vmatprep.subr.bf16.mxu1 %v3919_v20  ;;  %v3847_v60 = vld [vmem:[%s4763_s5 + $0x18] sm:$0xff]   ;;  %v3848_v61 = vld [vmem:[%s4763_s5 + $0x10] sm:$0xff]  }
 0x492   : > { %v2364_v2 = vpack.c.bf16 %v2361_v0, %v2360_v63  ;;  %v3849_v62 = vld [vmem:[%s4763_s5 + $0x8] sm:$0xff]   ;;  %v3245_v63 = vld [vmem:[%s4762_s4 + $0x3] ss:$0 sm:$0xff] }
 0x494   : > { %2518 = vmatmul.mubr.bf16.gmra.mxu1 %v2364_v2 }
 0x495   : > { %3524 = vmatpush3.bf16.msra.mxu1 %v3846_v59  ;;  %3533 = vmatprep.mubr.msk.bf16.mxu1 %vm3920_vm11, %v3919_v20 }
 0x496   : > { %3525 = vmatprep.subr.bf16.mxu1 %v3919_v20 }
 0x499   : > { %3526 = vmatpush3.bf16.msra.mxu1 %v3847_v60 }
 0x49a   : > { %3527 = vmatprep.subr.bf16.mxu1 %v3919_v20 }
 0x49d   : > { %3528 = vmatpush3.bf16.msra.mxu1 %v3848_v61 }
 0x49e   : > { %3529 = vmatprep.subr.bf16.mxu1 %v3919_v20 }
 0x4a1   : > { %3530 = vmatpush3.bf16.msra.mxu1 %v3849_v62 }
 0x4a2   : > { %3531 = vmatprep.subr.bf16.mxu1 %v3919_v20 }
 0x4a5   : > { %3532 = vmatpush3.bf16.msra.mxu1 %v3850_v5 }
 0x514   : > { %v2511_v14 = vpop.f32.mrf.mxu1 }
 0x515   : > { %v2512_v15 = vadd.f32 %v3205_v57, %v2511_v14 }
 0x516   : > { %v2513_v16 = vpop.f32.mrf.mxu1 }
 0x517   : > { %vm2526_vm4 = vcmp.ge.f32.partialorder %v2512_v15, 0.0  ;;  %v2530_v17 = vmul.f32 0.2, %v2512_v15 }
 0x518   : > { %v2514_v18 = vpop.f32.mrf.mxu1 }
 0x519   : > { %v2534_v19 = vsel %vm2526_vm4, %v2512_v15, %v2530_v17  ;;  %v2515_v22 = vadd.f32 %v3205_v57, %v2514_v18  ;;  %v3853_v18 = vld [vmem:[%s4765_s7 + $0x8] sm:$0xff]  }
 0x51a   : > { %2538 = vst.msk [vmem:[#allocation2] sm:$0xff] %vm1306_vm0, %v2534_v19  ;;  %v2516_v32 = vpop.f32.mrf.mxu1  ;;  %v3854_v19 = vld [vmem:[%s4765_s7] sm:$0xff]  }
 0x51b   : > { %vm2527_vm5 = vcmp.ge.f32.partialorder %v2515_v22, 0.0  ;;  %v2531_v23 = vmul.f32 0.2, %v2515_v22 }
 0x51d   : > { %v2535_v24 = vsel %vm2527_vm5, %v2515_v22, %v2531_v23  ;;  %v3259_v22 = vld [vmem:[%s4764_s6] ss:$0 sm:$0xff] }
 0x51e   : > { %2539 = vst.msk [vmem:[#allocation2 + $0x8] sm:$0xff] %vm1306_vm0, %v2535_v24 }
 0x525   : > { %v2544_v34 = vld [vmem:[#allocation2 + $0x1] ss:$2 sm:$0xff]  ;;  %v2542_v36 = vld [vmem:[#allocation2] ss:$2 sm:$0xff] }
 0x526   : > { %v2548_v43 = vrot.slane %v2544_v34, 7 }
 0x528   : > { %v2553_v47 = vsel %vm1418_vm1, 0.0, %v2548_v43 }
 0x529   : > { %v2562_v51 = vsel %vm2556_vm8, %v2553_v47, 0.0 }
 0x554   : > { %v2519_v25 = vpop.f32.mrf.mxu1 }
 0x555   : > { %v2520_v26 = vadd.f32 %v3205_v57, %v2519_v25 }
 0x556   : > { %v2521_v27 = vpop.f32.mrf.mxu1 }
 0x557   : > { %vm2528_vm6 = vcmp.ge.f32.partialorder %v2520_v26, 0.0  ;;  %v2532_v33 = vmul.f32 0.2, %v2520_v26 }
 0x558   : > { %v2522_v42 = vpop.f32.mrf.mxu1 }
 0x559   : > { %v2536_v28 = vsel %vm2528_vm6, %v2520_v26, %v2532_v33  ;;  %v2523_v9 = vadd.f32 %v3205_v57, %v2522_v42 }
 0x55a   : > { %2540 = vst.msk [vmem:[#allocation2 + $0x10] sm:$0xff] %vm1306_vm0, %v2536_v28  ;;  %v2524_v29 = vpop.f32.mrf.mxu1  ;;  %v3268_v28 = vld [vmem:[%s4766_s8] ss:$0 sm:$0xff] }
 0x55b   : > { %vm2529_vm7 = vcmp.ge.f32.partialorder %v2523_v9, 0.0  ;;  %v2533_v30 = vmul.f32 0.2, %v2523_v9 }
 0x55d   : > { %v2537_v3 = vsel %vm2529_vm7, %v2523_v9, %v2533_v30 }
 0x55e   : > { %2541 = vst.msk [vmem:[#allocation2 + $0x18] sm:$0xff] %vm1306_vm0, %v2537_v3 }
 0x565   : > { %v2545_v31 = vld [vmem:[#allocation2 + $0x11] ss:$2 sm:$0xff]  ;;  %v2543_v35 = vld [vmem:[#allocation2 + $0x10] ss:$2 sm:$0xff] }
 0x566   : > { %v2575_v39 = vpack.c.bf16 %v2545_v31, %v2544_v34  ;;  %v3662_v40 = vpack.i.bf16 %v2543_v35, %v2542_v36  ;;  %v2549_v41 = vrot.slane %v2545_v31, 7 }
 0x568   : > { %3258 = vmatprep.mubr.msk.bf16.mxu0 %vm1306_vm0, %v2575_v39  ;;  %3663 = vrot.lane.b32.xlu0 %v3662_v40, %s3918_s22  ;;  %v2550_v46 = vsel %vm1418_vm1, %v2548_v43, %v2549_v41 }
 0x569   : > { %v2563_v52 = vsel %vm2557_vm9, %v2550_v46, 0.0 }
 0x5da   : > { %v3664_v48 = vpop.permute.xlu0 %3663 }
 0x5db   : > { %v3666_v49 = vunpack.i.h.bf16 %v3664_v48  ;;  %v3665_v50 = vunpack.i.l.bf16 %v3664_v48 }
 0x5dd   : > { %v2573_v53 = vsel %vm1306_vm0, %v2563_v52, %v3666_v49  ;;  %v2572_v54 = vsel %vm1306_vm0, %v2562_v51, %v3665_v50 }
 0x5de   : > { %v2574_v55 = vpack.c.bf16 %v2573_v53, %v2572_v54 }
 0x5e0   : > { %2717 = vmatmul.mubr.bf16.vlgmr.msra.gmra.mxu0 %v2574_v55 }
 0x5e1   : > { %3545 = vmatprep.mubr.msk.bf16.mxu0 %vm3920_vm11, %v3919_v20  ;;  %3538 = vmatpush3.bf16.msra.mxu0 %v3851_v11 }
 0x5e2   : > { %3539 = vmatprep.subr.bf16.mxu0 %v3919_v20 }
 0x5e5   : > { %3540 = vmatpush3.bf16.msra.mxu0 %v3852_v13 }
 0x5e6   : > { %3541 = vmatprep.subr.bf16.mxu0 %v3919_v20 }
 0x5e9   : > { %3542 = vmatpush3.bf16.msra.mxu0 %v3853_v18 }
 0x5ea   : > { %3543 = vmatprep.subr.bf16.mxu0 %v3919_v20 }
 0x5ed   : > { %3544 = vmatpush3.bf16.msra.mxu0 %v3854_v19 }
 0x6a0   : > { %v2718_v0 = vpop.f32.mrf.mxu0 }
 0x6a1   : > { %v2719_v2 = vadd.f32 %v3245_v63, %v2718_v0 }
 0x6a2   : > { %v2720_v38 = vpop.f32.mrf.mxu0 }
 0x6a3   : > { %vm2725_vm1 = vcmp.ge.f32.partialorder %v2719_v2, 0.0  ;;  %v2727_v37 = vmul.f32 0.2, %v2719_v2 }
 0x6a4   : > { %v2721_v4 = vpop.f32.mrf.mxu0 }
 0x6a5   : > { %v2729_v6 = vsel %vm2725_vm1, %v2719_v2, %v2727_v37  ;;  %v2722_v7 = vadd.f32 %v3245_v63, %v2721_v4 }
 0x6a6   : > { %2731 = vst.msk [vmem:[#allocation2] sm:$0xff] %vm1306_vm0, %v2729_v6  ;;  %v2723_v8 = vpop.f32.mrf.mxu0 }
 0x6a7   : > { %vm2726_vm10 = vcmp.ge.f32.partialorder %v2722_v7, 0.0  ;;  %v2728_v10 = vmul.f32 0.2, %v2722_v7 }
 0x6a9   : > { %v2730_v12 = vsel %vm2726_vm10, %v2722_v7, %v2728_v10 }
 0x6aa   : > { %2732 = vst.msk [vmem:[#allocation2 + $0x8] sm:$0xff] %vm1306_vm0, %v2730_v12 }
 0x6b1   : > { %v2734_v57 = vld [vmem:[#allocation2 + $0x1] ss:$2 sm:$0xff]  ;;  %v2733_v15 = vld [vmem:[#allocation2] ss:$2 sm:$0xff] }
 0x6b2   : > { %2736 = vrot.lane.b32.xlu1 %v2734_v57, %s3918_s22  ;;  %s2940_s22 = scalar_lea.sflag [#allocation4], %s326_s28 }
 0x724   : > { %v2737_v14 = vpop.permute.xlu1 %2736 }
 0x725   : > { %v2739_v16 = vsel %vm1306_vm0, %v2733_v15, %v2737_v14 }
 0x726   : > { %v2740_v17 = vpack.c.bf16 %v2739_v16, %v2739_v16 }
 0x728   : > { %3534 = vmatmul.mubr.bf16.vlgmr.msra.gmra.mxu1 %v2740_v17 }
 0x7e8   : > { %v2846_v32 = vpop.f32.mrf.mxu1 }
 0x7e9   : > { %v2847_v23 = vadd.f32 %v3259_v22, %v2846_v32 }
 0x7ea   : > { %v3535_v24 = vpop.f32.mrf.mxu1 }
 0x7eb   : > { %vm2852_vm12 = vcmp.ge.f32.partialorder %v2847_v23, 0.0  ;;  %v2853_v25 = vmul.f32 0.2, %v2847_v23 }
 0x7ec   : > { %v2849_v26 = vpop.f32.mrf.mxu1 }
 0x7ed   : > { %v2854_v27 = vsel %vm2852_vm12, %v2847_v23, %v2853_v25 }
 0x7ee   : > { %v2855_v33 = vpack.c.bf16 %v2854_v27, %v2854_v27  ;;  %v3536_v42 = vpop.f32.mrf.mxu1 }
 0x7f0   : > { %3546 = vmatmul.mubr.msk.bf16.vlgmr.msra.gmra.mxu0 %vm1306_vm0, %v2855_v33 }
 0x8b0   : > { %v2932_v9 = vpop.f32.mrf.mxu0 }
 0x8b1   : > { %v2933_v29 = vadd.f32 %v3268_v28, %v2932_v9 }
 0x8b2   : > { %v3547_v30 = vpop.f32.mrf.mxu0 }
 0x8b3   : > { %2938 = vst.msk [vmem:[%s328_s23] sm:$0xff] %vm1306_vm0, %v2933_v29 }
 0x8b4   : > { %v2935_v1 = vpop.f32.mrf.mxu0 }
 0x8b5   : > { %3868 = shalt.err (!%p3865_p3)
}
 0x8b6   : > { %s3869_s14 = scalar_lea.hbm %s4716_s27, 128  ;;  %s3873_s23 = scalar_lea.hbm %s4767_s9, 256 }
 0x8b7   : > { %p3870_p4 = scmp.ne.s32.totalorder %s4716_s27, %s3869_s14  ;;  %p3874_p9 = scmp.lt.s32.totalorder %s4716_s27, %s4767_s9 }
 0x8b8   : > { %p3875_p10 = scmp.lt.s32.totalorder %s3873_s23, %s3869_s14 }
 0x8b9   : > { %p3871_p7 = pnand %p3870_p4, %p4010_p5 }
 0x8ba   : > { %p3876_p11 = por %p3875_p10, %p3874_p9 }
 0x8bb   : > { %p3872_p8 = pneg %p3871_p7 }
 0x8bd   : > { %p3877_p12 = pnand %p3876_p11, %p3872_p8 }
 0x8bf   : > { %3880 = shalt.err (!%p3877_p12)
}
 0x8c0   : > { %3549 = dma.vmem_to_hbm [thread:$0]  (%p4010_p5), %s4718_s24, 128, %s4716_s27, %s2940_s22   ;;  %v3548_v3 = vpop.f32.mrf.mxu0 }
 0x8c1 PF: > { %p3555_p13 = scmp.ge.s32.totalorder %s3915_s12, 2  ;;  %s2965_s13 = sand.u32 1, %s3903_s30  }
 0x8c2   : > { %s2966_s29 = scalar_lea.sflag [#allocation4], %s2965_s13 }
 0x8c3   : > { %p3552_p0 = pnand %p3555_p13, %p4014_p6 }
 0x8c5   : > { %p3553_p1 = pneg %p3552_p0 }
 0x8c7   : > { %3898 = dma.done.wait (%p3553_p1), %s2966_s29, 128  }
 0x8c8   : > { %3900 = vsyncadd (%p3553_p1), %s2966_s29, 4294967168  ;;  %p19_p2 = scmp.ge.s32.totalorder %s3997_s15, 4   ;;  %s4770_s30 = smov %s3907_s10 }
 0x8c9   : > { %s4771_s10 = smov %s3911_s11  ;;  %s4772_s11 = smov %s4008_s18 }
 0x8ca   : > { %s4773_s12 = smov %s3997_s15  ;;  %21 = sbr.rel (!%p19_p2) target bundleno = 3 (0x3), region = 128 }
 0x8cf   :  { %2971 = vsyncpa [#allocation4], 1 }
 0x8d0   :  { %2973 = vsyncpa [#allocation4 + $0x1], 1 }

</bundles_post_ra>
